<compile_context>
chip_gen: v6e
topology: v6e:2x2x1
jax: 0.10.0
libtpu: 0.0.40
codegen_flags: <defaults>
</compile_context>

<pallas_src>
import functools

import jax
import jax.numpy as jnp
from jax.experimental import pallas as pl
from jax.experimental.pallas import tpu as pltpu


# ---------------------------------------------------------------------------
# Fused FeedForward kernel (one grid step = one batch x one hidden-ch tile)
# ---------------------------------------------------------------------------
def _ffn_kernel(masks_ref, x_ref, wi_ref, bi_ref, dw_ref, db_ref,
                wo_ref, bo_ref, o_ref, acc_ref, *, img_w, tch):
    g = pl.program_id(1)
    n = x_ref.shape[-1]                              # padded H*W (multiple of 128)

    # ---- project_in (1x1 conv): both gate halves in one MXU matmul ---------
    x = x_ref[0]                                     # (C, Np) bf16, lane-dense
    y = jnp.dot(wi_ref[0], x, preferred_element_type=jnp.float32) + bi_ref[0]
    # y: (2*tch, Np) f32; rows [0,tch) = gate half 1, rows [tch,2*tch) = half 2

    # ---- depthwise 3x3 conv (padding=1) on the flattened H*W lane axis -----
    masks = masks_ref[...].astype(jnp.float32)       # (9, Np) boundary masks
    dw = dw_ref[0]                                   # (2*tch, 9) f32
    acc = jnp.zeros_like(y)
    for k in range(9):
        dy, dx = divmod(k, 3)
        s = (dy - 1) * img_w + (dx - 1)              # static flat-lane shift
        # out[:, i] = y[:, (i + s) % n]; wrapped/pad entries are killed by mask
        t = y if s == 0 else pltpu.roll(y, shift=(-s) % n, axis=1)
        if k == 4:                                   # center tap: mask all-ones
            acc = acc + t * dw[:, k:k + 1]
        else:
            acc = acc + (t * masks[k:k + 1, :]) * dw[:, k:k + 1]
    z = acc + db_ref[0]                              # (2*tch, Np) f32

    z1 = z[:tch]                                     # sublane-aligned split
    z2 = z[tch:]

    # ---- gate: exact erf-GELU(z1) * z2 --------------------------------------
    # erf via Abramowitz & Stegun 7.1.26 (|err| <= 1.5e-7); exp + approx
    # reciprocal run on the EUP, sign handled with a compare+select.
    v = z1 * 0.7071067811865476
    av = jnp.abs(v)
    t_ = pl.reciprocal(1.0 + 0.3275911 * av, approx=True)
    poly = ((((1.061405429 * t_ - 1.453152027) * t_ + 1.421413741) * t_
             - 0.284496736) * t_ + 0.254829592) * t_
    half_pe = (0.5 * poly) * jnp.exp(-av * av)
    cdf = jnp.where(v >= 0.0, 1.0 - half_pe, half_pe)   # = 0.5*(1+erf(v))
    gated = (z1 * cdf) * z2                          # (tch, Np) f32

    # ---- project_out contribution of this hidden tile; accumulate in VMEM --
    contrib = jnp.dot(wo_ref[0], gated.astype(jnp.bfloat16),
                      preferred_element_type=jnp.float32)

    @pl.when(g == 0)
    def _():
        acc_ref[...] = contrib + bo_ref[...]

    @pl.when(g > 0)
    def _():
        acc_ref[...] = acc_ref[...] + contrib

    @pl.when(g == pl.num_programs(1) - 1)
    def _():
        o_ref[0] = acc_ref[...]


# ---------------------------------------------------------------------------
# Wrapper: layout plumbing + pallas_call
# ---------------------------------------------------------------------------
def feedforward_forward(x, params, *, block_hidden=None, max_block_hidden=256,
                        vmem_limit_bytes=64 * 1024 * 1024):
    B, C, H, W = x.shape
    N = H * W
    Np = ((N + 127) // 128) * 128                    # lane-dense padded spatial
    dim_out, hidden = params["w_out"].shape

    # hidden-channel tile: largest divisor of hidden that is a multiple of 8
    # and <= max_block_hidden (per-generation tuning knob).
    if block_hidden is None:
        block_hidden = hidden
        for cand in range(min(hidden, max_block_hidden), 7, -1):
            if hidden % cand == 0 and cand % 8 == 0:
                block_hidden = cand
                break
    tch = block_hidden
    assert hidden % tch == 0
    G = hidden // tch

    f32, bf16 = jnp.float32, jnp.bfloat16

    # activations: (C, H*W) lane-dense, zero-padded to Np, bf16 for the MXU
    x_cn = x.reshape(B, C, N).astype(f32)
    x_cn = jnp.pad(x_cn, ((0, 0), (0, 0), (0, Np - N))).astype(bf16)

    # weights rearranged so grid step g sees BOTH gate halves of its hidden
    # tile stacked along the sublane axis: rows [0,tch)=half1, [tch,2tch)=half2
    def fuse_halves(a, trailing_shape):
        a1 = a[:hidden].reshape((G, tch) + trailing_shape)
        a2 = a[hidden:].reshape((G, tch) + trailing_shape)
        return jnp.concatenate([a1, a2], axis=1)

    w_in_g = fuse_halves(params["w_in"].astype(f32), (C,)).astype(bf16)       # (G,2t,C)
    b_in_g = fuse_halves(params["b_in"].astype(f32), (1,))                    # (G,2t,1)
    dw_g = fuse_halves(params["dw_w"].reshape(2 * hidden, 9).astype(f32), (9,))
    db_g = fuse_halves(params["dw_b"].astype(f32), (1,))
    w_out_g = (params["w_out"].astype(f32)
               .reshape(dim_out, G, tch).transpose(1, 0, 2)).astype(bf16)     # (G,dim,t)
    b_out = params["b_out"].astype(f32).reshape(dim_out, 1)

    # zero-padding boundary masks for the 9 taps on the (padded) flat H*W axis
    h_idx = jnp.arange(H)[:, None]
    w_idx = jnp.arange(W)[None, :]
    masks = []
    for dy in range(3):
        for dx in range(3):
            valid = ((h_idx + dy - 1 >= 0) & (h_idx + dy - 1 < H)
                     & (w_idx + dx - 1 >= 0) & (w_idx + dx - 1 < W))
            masks.append(jnp.pad(valid.reshape(N), (0, Np - N)))
    masks = jnp.stack(masks, axis=0).astype(bf16)                             # (9,Np)

    kernel = functools.partial(_ffn_kernel, img_w=W, tch=tch)

    out = pl.pallas_call(
        kernel,
        out_shape=jax.ShapeDtypeStruct((B, dim_out, Np), f32),
        grid=(B, G),
        in_specs=[
            pl.BlockSpec((9, Np), lambda b, g: (0, 0)),                # tap masks
            pl.BlockSpec((1, C, Np), lambda b, g: (b, 0, 0)),          # x (resident over g)
            pl.BlockSpec((1, 2 * tch, C), lambda b, g: (g, 0, 0)),     # w_in tile (both halves)
            pl.BlockSpec((1, 2 * tch, 1), lambda b, g: (g, 0, 0)),     # b_in tile
            pl.BlockSpec((1, 2 * tch, 9), lambda b, g: (g, 0, 0)),     # dw weights tile
            pl.BlockSpec((1, 2 * tch, 1), lambda b, g: (g, 0, 0)),     # dw bias tile
            pl.BlockSpec((1, dim_out, tch), lambda b, g: (g, 0, 0)),   # w_out tile
            pl.BlockSpec((dim_out, 1), lambda b, g: (0, 0)),           # b_out
        ],
        out_specs=pl.BlockSpec((1, dim_out, Np), lambda b, g: (b, 0, 0)),
        scratch_shapes=[pltpu.VMEM((dim_out, Np), f32)],               # project_out accumulator
        compiler_params=pltpu.CompilerParams(
            dimension_semantics=("parallel", "arbitrary"),
            vmem_limit_bytes=vmem_limit_bytes),
    )(masks, x_cn, w_in_g, b_in_g, dw_g, db_g, w_out_g, b_out)

    return out[:, :, :N].reshape(B, dim_out, H, W)


# ---------------------------------------------------------------------------
# Pure-JAX reference (f32 numerics sanity check)
# ---------------------------------------------------------------------------
def reference_forward(x, params):
    B, C, H, W = x.shape
    hidden = params["w_out"].shape[1]
    y = (jnp.einsum("oc,bchw->bohw", params["w_in"], x)
         + params["b_in"][None, :, None, None])
    yp = jnp.pad(y, ((0, 0), (0, 0), (1, 1), (1, 1)))
    acc = jnp.zeros_like(y)
    for dy in range(3):
        for dx in range(3):
            acc = acc + (yp[:, :, dy:dy + H, dx:dx + W]
                         * params["dw_w"][None, :, dy, dx, None, None])
    y = acc + params["dw_b"][None, :, None, None]
    x1, x2 = y[:, :hidden], y[:, hidden:]
    g = jax.nn.gelu(x1, approximate=False) * x2
    out = (jnp.einsum("oc,bchw->bohw", params["w_out"], g)
           + params["b_out"][None, :, None, None])
    return out


# ---------------------------------------------------------------------------
if __name__ == "__main__":
    B, dim, H, W = 2, 16, 16, 16
    ffn_expansion_factor = 2
    hidden = int(dim * ffn_expansion_factor)          # 32

    key = jax.random.PRNGKey(0)
    kx, k1, k2, k3, k4, k5, k6 = jax.random.split(key, 7)

    x = jax.random.normal(kx, (B, dim, H, W), dtype=jnp.float32)

    params = {
        # project_in 1x1 conv: (2*hidden, dim) weight, (2*hidden,) bias
        "w_in": 0.2 * jax.random.normal(k1, (2 * hidden, dim), jnp.float32),
        "b_in": 0.05 * jax.random.normal(k2, (2 * hidden,), jnp.float32),
        # depthwise 3x3 conv, groups = 2*hidden
        "dw_w": 0.2 * jax.random.normal(k3, (2 * hidden, 3, 3), jnp.float32),
        "dw_b": 0.05 * jax.random.normal(k4, (2 * hidden,), jnp.float32),
        # project_out 1x1 conv: (dim, hidden) weight, (dim,) bias
        "w_out": 0.2 * jax.random.normal(k5, (dim, hidden), jnp.float32),
        "b_out": 0.05 * jax.random.normal(k6, (dim,), jnp.float32),
    }

    out = feedforward_forward(x, params)
    out = jax.block_until_ready(out)

    ref = jax.block_until_ready(reference_forward(x, params))

    assert out.shape == (B, dim, H, W)
    assert bool(jnp.all(jnp.isfinite(out)))
    # tolerance sized for bf16 matmul inputs with f32 MXU accumulation
    assert bool(jnp.allclose(out, ref, atol=2e-2, rtol=2e-2)), "mismatch vs reference"

    print("KERNEL_OK")
</pallas_src>

<mosaic_0001>
module attributes {stable_mosaic.version = 11 : i64} {
  func.func @_ffn_kernel(%arg0: i32, %arg1: i32, %arg2: memref<9x256xbf16, #tpu.memory_space<vmem>>, %arg3: memref<1x16x256xbf16, #tpu.memory_space<vmem>>, %arg4: memref<1x64x16xbf16, #tpu.memory_space<vmem>>, %arg5: memref<1x64x1xf32, #tpu.memory_space<vmem>>, %arg6: memref<1x64x9xf32, #tpu.memory_space<vmem>>, %arg7: memref<1x64x1xf32, #tpu.memory_space<vmem>>, %arg8: memref<1x16x32xbf16, #tpu.memory_space<vmem>>, %arg9: memref<16x1xf32, #tpu.memory_space<vmem>>, %arg10: memref<1x16x256xf32, #tpu.memory_space<vmem>>, %arg11: memref<16x256xf32, #tpu.memory_space<vmem>>) attributes {dimension_semantics = [#tpu.dimension_semantics<parallel>, #tpu.dimension_semantics<arbitrary>], iteration_bounds = array<i64: 2, 1>, scalar_prefetch = 0 : i64, scratch_operands = 1 : i64, tpu.core_type = #tpu.core_type<tc>, window_params = [{pipeline_mode = #tpu.pipeline_mode<synchronous>, transform_indices = @transform_0, window_bounds = array<i64: 9, 256>}, {transform_indices = @transform_1, window_bounds = array<i64: 1, 16, 256>}, {transform_indices = @transform_2, window_bounds = array<i64: 1, 64, 16>}, {transform_indices = @transform_3, window_bounds = array<i64: 1, 64, 1>}, {transform_indices = @transform_4, window_bounds = array<i64: 1, 64, 9>}, {transform_indices = @transform_5, window_bounds = array<i64: 1, 64, 1>}, {transform_indices = @transform_6, window_bounds = array<i64: 1, 16, 32>}, {pipeline_mode = #tpu.pipeline_mode<synchronous>, transform_indices = @transform_7, window_bounds = array<i64: 16, 1>}, {transform_indices = @transform_8, window_bounds = array<i64: 1, 16, 256>}]} {
    %c0 = arith.constant 0 : index
    %c0_0 = arith.constant 0 : index
    %c0_1 = arith.constant 0 : index
    %0 = vector.load %arg3[%c0, %c0_0, %c0_1] : memref<1x16x256xbf16, #tpu.memory_space<vmem>>, vector<1x16x256xbf16>
    %1 = vector.shape_cast %0 : vector<1x16x256xbf16> to vector<16x256xbf16>
    %c0_2 = arith.constant 0 : index
    %c0_3 = arith.constant 0 : index
    %c0_4 = arith.constant 0 : index
    %2 = vector.load %arg4[%c0_2, %c0_3, %c0_4] : memref<1x64x16xbf16, #tpu.memory_space<vmem>>, vector<1x64x16xbf16>
    %3 = vector.shape_cast %2 : vector<1x64x16xbf16> to vector<64x16xbf16>
    %cst = arith.constant dense<0.000000e+00> : vector<64x256xf32>
    %4 = tpu.matmul %3, %1, %cst {dimension_numbers = #tpu.dot_dimension_numbers<[1], [0], [0], [1], [0, 0, 1, 1], [], []>} : vector<64x16xbf16>, vector<16x256xbf16>, vector<64x256xf32> -> vector<64x256xf32>
    %c0_5 = arith.constant 0 : index
    %c0_6 = arith.constant 0 : index
    %c0_7 = arith.constant 0 : index
    %5 = vector.load %arg5[%c0_5, %c0_6, %c0_7] : memref<1x64x1xf32, #tpu.memory_space<vmem>>, vector<1x64x1xf32>
    %6 = vector.shape_cast %5 : vector<1x64x1xf32> to vector<64x1xf32>
    %7 = vector.broadcast %6 : vector<64x1xf32> to vector<64x256xf32>
    %8 = arith.addf %4, %7 : vector<64x256xf32>
    %c0_8 = arith.constant 0 : index
    %c0_9 = arith.constant 0 : index
    %9 = vector.load %arg2[%c0_8, %c0_9] : memref<9x256xbf16, #tpu.memory_space<vmem>>, vector<9x256xbf16>
    %10 = arith.extf %9 : vector<9x256xbf16> to vector<9x256xf32>
    %c0_10 = arith.constant 0 : index
    %c0_11 = arith.constant 0 : index
    %c0_12 = arith.constant 0 : index
    %11 = vector.load %arg6[%c0_10, %c0_11, %c0_12] : memref<1x64x9xf32, #tpu.memory_space<vmem>>, vector<1x64x9xf32>
    %12 = vector.shape_cast %11 : vector<1x64x9xf32> to vector<64x9xf32>
    %cst_13 = arith.constant 0.000000e+00 : f32
    %13 = vector.broadcast %cst_13 : f32 to vector<64x256xf32>
    %c17_i32 = arith.constant 17 : i32
    %14 = tpu.dynamic_rotate %8 by %c17_i32 dim 1 : vector<64x256xf32>, i32 -> vector<64x256xf32>
    %15 = vector.extract_strided_slice %10 {offsets = [0, 0], sizes = [1, 256], strides = [1, 1]} : vector<9x256xf32> to vector<1x256xf32>
    %16 = vector.broadcast %15 : vector<1x256xf32> to vector<64x256xf32>
    %17 = arith.mulf %14, %16 : vector<64x256xf32>
    %18 = vector.extract_strided_slice %12 {offsets = [0, 0], sizes = [64, 1], strides = [1, 1]} : vector<64x9xf32> to vector<64x1xf32>
    %19 = vector.broadcast %18 : vector<64x1xf32> to vector<64x256xf32>
    %20 = arith.mulf %17, %19 : vector<64x256xf32>
    %21 = arith.addf %13, %20 : vector<64x256xf32>
    %c16_i32 = arith.constant 16 : i32
    %22 = tpu.dynamic_rotate %8 by %c16_i32 dim 1 : vector<64x256xf32>, i32 -> vector<64x256xf32>
    %23 = vector.extract_strided_slice %10 {offsets = [1, 0], sizes = [1, 256], strides = [1, 1]} : vector<9x256xf32> to vector<1x256xf32>
    %24 = vector.broadcast %23 : vector<1x256xf32> to vector<64x256xf32>
    %25 = arith.mulf %22, %24 : vector<64x256xf32>
    %26 = vector.extract_strided_slice %12 {offsets = [0, 1], sizes = [64, 1], strides = [1, 1]} : vector<64x9xf32> to vector<64x1xf32>
    %27 = vector.broadcast %26 : vector<64x1xf32> to vector<64x256xf32>
    %28 = arith.mulf %25, %27 : vector<64x256xf32>
    %29 = arith.addf %21, %28 : vector<64x256xf32>
    %c15_i32 = arith.constant 15 : i32
    %30 = tpu.dynamic_rotate %8 by %c15_i32 dim 1 : vector<64x256xf32>, i32 -> vector<64x256xf32>
    %31 = vector.extract_strided_slice %10 {offsets = [2, 0], sizes = [1, 256], strides = [1, 1]} : vector<9x256xf32> to vector<1x256xf32>
    %32 = vector.broadcast %31 : vector<1x256xf32> to vector<64x256xf32>
    %33 = arith.mulf %30, %32 : vector<64x256xf32>
    %34 = vector.extract_strided_slice %12 {offsets = [0, 2], sizes = [64, 1], strides = [1, 1]} : vector<64x9xf32> to vector<64x1xf32>
    %35 = vector.broadcast %34 : vector<64x1xf32> to vector<64x256xf32>
    %36 = arith.mulf %33, %35 : vector<64x256xf32>
    %37 = arith.addf %29, %36 : vector<64x256xf32>
    %c1_i32 = arith.constant 1 : i32
    %38 = tpu.dynamic_rotate %8 by %c1_i32 dim 1 : vector<64x256xf32>, i32 -> vector<64x256xf32>
    %39 = vector.extract_strided_slice %10 {offsets = [3, 0], sizes = [1, 256], strides = [1, 1]} : vector<9x256xf32> to vector<1x256xf32>
    %40 = vector.broadcast %39 : vector<1x256xf32> to vector<64x256xf32>
    %41 = arith.mulf %38, %40 : vector<64x256xf32>
    %42 = vector.extract_strided_slice %12 {offsets = [0, 3], sizes = [64, 1], strides = [1, 1]} : vector<64x9xf32> to vector<64x1xf32>
    %43 = vector.broadcast %42 : vector<64x1xf32> to vector<64x256xf32>
    %44 = arith.mulf %41, %43 : vector<64x256xf32>
    %45 = arith.addf %37, %44 : vector<64x256xf32>
    %46 = vector.extract_strided_slice %12 {offsets = [0, 4], sizes = [64, 1], strides = [1, 1]} : vector<64x9xf32> to vector<64x1xf32>
    %47 = vector.broadcast %46 : vector<64x1xf32> to vector<64x256xf32>
    %48 = arith.mulf %8, %47 : vector<64x256xf32>
    %49 = arith.addf %45, %48 : vector<64x256xf32>
    %c255_i32 = arith.constant 255 : i32
    %50 = tpu.dynamic_rotate %8 by %c255_i32 dim 1 : vector<64x256xf32>, i32 -> vector<64x256xf32>
    %51 = vector.extract_strided_slice %10 {offsets = [5, 0], sizes = [1, 256], strides = [1, 1]} : vector<9x256xf32> to vector<1x256xf32>
    %52 = vector.broadcast %51 : vector<1x256xf32> to vector<64x256xf32>
    %53 = arith.mulf %50, %52 : vector<64x256xf32>
    %54 = vector.extract_strided_slice %12 {offsets = [0, 5], sizes = [64, 1], strides = [1, 1]} : vector<64x9xf32> to vector<64x1xf32>
    %55 = vector.broadcast %54 : vector<64x1xf32> to vector<64x256xf32>
    %56 = arith.mulf %53, %55 : vector<64x256xf32>
    %57 = arith.addf %49, %56 : vector<64x256xf32>
    %c241_i32 = arith.constant 241 : i32
    %58 = tpu.dynamic_rotate %8 by %c241_i32 dim 1 : vector<64x256xf32>, i32 -> vector<64x256xf32>
    %59 = vector.extract_strided_slice %10 {offsets = [6, 0], sizes = [1, 256], strides = [1, 1]} : vector<9x256xf32> to vector<1x256xf32>
    %60 = vector.broadcast %59 : vector<1x256xf32> to vector<64x256xf32>
    %61 = arith.mulf %58, %60 : vector<64x256xf32>
    %62 = vector.extract_strided_slice %12 {offsets = [0, 6], sizes = [64, 1], strides = [1, 1]} : vector<64x9xf32> to vector<64x1xf32>
    %63 = vector.broadcast %62 : vector<64x1xf32> to vector<64x256xf32>
    %64 = arith.mulf %61, %63 : vector<64x256xf32>
    %65 = arith.addf %57, %64 : vector<64x256xf32>
    %c240_i32 = arith.constant 240 : i32
    %66 = tpu.dynamic_rotate %8 by %c240_i32 dim 1 : vector<64x256xf32>, i32 -> vector<64x256xf32>
    %67 = vector.extract_strided_slice %10 {offsets = [7, 0], sizes = [1, 256], strides = [1, 1]} : vector<9x256xf32> to vector<1x256xf32>
    %68 = vector.broadcast %67 : vector<1x256xf32> to vector<64x256xf32>
    %69 = arith.mulf %66, %68 : vector<64x256xf32>
    %70 = vector.extract_strided_slice %12 {offsets = [0, 7], sizes = [64, 1], strides = [1, 1]} : vector<64x9xf32> to vector<64x1xf32>
    %71 = vector.broadcast %70 : vector<64x1xf32> to vector<64x256xf32>
    %72 = arith.mulf %69, %71 : vector<64x256xf32>
    %73 = arith.addf %65, %72 : vector<64x256xf32>
    %c239_i32 = arith.constant 239 : i32
    %74 = tpu.dynamic_rotate %8 by %c239_i32 dim 1 : vector<64x256xf32>, i32 -> vector<64x256xf32>
    %75 = vector.extract_strided_slice %10 {offsets = [8, 0], sizes = [1, 256], strides = [1, 1]} : vector<9x256xf32> to vector<1x256xf32>
    %76 = vector.broadcast %75 : vector<1x256xf32> to vector<64x256xf32>
    %77 = arith.mulf %74, %76 : vector<64x256xf32>
    %78 = vector.extract_strided_slice %12 {offsets = [0, 8], sizes = [64, 1], strides = [1, 1]} : vector<64x9xf32> to vector<64x1xf32>
    %79 = vector.broadcast %78 : vector<64x1xf32> to vector<64x256xf32>
    %80 = arith.mulf %77, %79 : vector<64x256xf32>
    %81 = arith.addf %73, %80 : vector<64x256xf32>
    %c0_14 = arith.constant 0 : index
    %c0_15 = arith.constant 0 : index
    %c0_16 = arith.constant 0 : index
    %82 = vector.load %arg7[%c0_14, %c0_15, %c0_16] : memref<1x64x1xf32, #tpu.memory_space<vmem>>, vector<1x64x1xf32>
    %83 = vector.shape_cast %82 : vector<1x64x1xf32> to vector<64x1xf32>
    %84 = vector.broadcast %83 : vector<64x1xf32> to vector<64x256xf32>
    %85 = arith.addf %81, %84 : vector<64x256xf32>
    %86 = vector.extract_strided_slice %85 {offsets = [0, 0], sizes = [32, 256], strides = [1, 1]} : vector<64x256xf32> to vector<32x256xf32>
    %87 = vector.extract_strided_slice %85 {offsets = [32, 0], sizes = [32, 256], strides = [1, 1]} : vector<64x256xf32> to vector<32x256xf32>
    %cst_17 = arith.constant 0.707106769 : f32
    %88 = vector.broadcast %cst_17 : f32 to vector<32x256xf32>
    %89 = arith.mulf %86, %88 : vector<32x256xf32>
    %90 = math.absf %89 : vector<32x256xf32>
    %cst_18 = arith.constant 0.327591091 : f32
    %91 = vector.broadcast %cst_18 : f32 to vector<32x256xf32>
    %92 = arith.mulf %91, %90 : vector<32x256xf32>
    %cst_19 = arith.constant 1.000000e+00 : f32
    %93 = vector.broadcast %cst_19 : f32 to vector<32x256xf32>
    %94 = arith.addf %93, %92 : vector<32x256xf32>
    %95 = tpu.reciprocal %94 {approx = true} : vector<32x256xf32> -> vector<32x256xf32>
    %cst_20 = arith.constant 1.06140542 : f32
    %96 = vector.broadcast %cst_20 : f32 to vector<32x256xf32>
    %97 = arith.mulf %96, %95 : vector<32x256xf32>
    %cst_21 = arith.constant 1.45315206 : f32
    %98 = vector.broadcast %cst_21 : f32 to vector<32x256xf32>
    %99 = arith.subf %97, %98 : vector<32x256xf32>
    %100 = arith.mulf %99, %95 : vector<32x256xf32>
    %cst_22 = arith.constant 1.42141378 : f32
    %101 = vector.broadcast %cst_22 : f32 to vector<32x256xf32>
    %102 = arith.addf %100, %101 : vector<32x256xf32>
    %103 = arith.mulf %102, %95 : vector<32x256xf32>
    %cst_23 = arith.constant 0.284496725 : f32
    %104 = vector.broadcast %cst_23 : f32 to vector<32x256xf32>
    %105 = arith.subf %103, %104 : vector<32x256xf32>
    %106 = arith.mulf %105, %95 : vector<32x256xf32>
    %cst_24 = arith.constant 0.254829586 : f32
    %107 = vector.broadcast %cst_24 : f32 to vector<32x256xf32>
    %108 = arith.addf %106, %107 : vector<32x256xf32>
    %109 = arith.mulf %108, %95 : vector<32x256xf32>
    %cst_25 = arith.constant 5.000000e-01 : f32
    %110 = vector.broadcast %cst_25 : f32 to vector<32x256xf32>
    %111 = arith.mulf %110, %109 : vector<32x256xf32>
    %cst_26 = arith.constant 0.000000e+00 : f32
    %112 = vector.broadcast %cst_26 : f32 to vector<32x256xf32>
    %113 = arith.subf %112, %90 : vector<32x256xf32>
    %114 = arith.mulf %113, %90 : vector<32x256xf32>
    %115 = math.exp %114 : vector<32x256xf32>
    %116 = arith.mulf %111, %115 : vector<32x256xf32>
    %cst_27 = arith.constant 0.000000e+00 : f32
    %117 = vector.broadcast %cst_27 : f32 to vector<32x256xf32>
    %118 = arith.cmpf oge, %89, %117 : vector<32x256xf32>
    %cst_28 = arith.constant 1.000000e+00 : f32
    %119 = vector.broadcast %cst_28 : f32 to vector<32x256xf32>
    %120 = arith.subf %119, %116 : vector<32x256xf32>
    %121 = arith.select %118, %120, %116 : vector<32x256xi1>, vector<32x256xf32>
    %122 = arith.mulf %86, %121 : vector<32x256xf32>
    %123 = arith.mulf %122, %87 : vector<32x256xf32>
    %c0_29 = arith.constant 0 : index
    %c0_30 = arith.constant 0 : index
    %c0_31 = arith.constant 0 : index
    %124 = vector.load %arg8[%c0_29, %c0_30, %c0_31] : memref<1x16x32xbf16, #tpu.memory_space<vmem>>, vector<1x16x32xbf16>
    %125 = vector.shape_cast %124 : vector<1x16x32xbf16> to vector<16x32xbf16>
    %126 = arith.truncf %123 : vector<32x256xf32> to vector<32x256xbf16>
    %cst_32 = arith.constant dense<0.000000e+00> : vector<16x256xf32>
    %127 = tpu.matmul %125, %126, %cst_32 {dimension_numbers = #tpu.dot_dimension_numbers<[1], [0], [0], [1], [0, 0, 1, 1], [], []>} : vector<16x32xbf16>, vector<32x256xbf16>, vector<16x256xf32> -> vector<16x256xf32>
    %c0_i32 = arith.constant 0 : i32
    %128 = arith.cmpi eq, %arg1, %c0_i32 : i32
    %129 = arith.extui %128 : i1 to i32
    %c0_i32_33 = arith.constant 0 : i32
    %130 = arith.cmpi ne, %129, %c0_i32_33 : i32
    scf.if %130 {
      %c0_38 = arith.constant 0 : index
      %c0_39 = arith.constant 0 : index
      %137 = vector.load %arg9[%c0_38, %c0_39] : memref<16x1xf32, #tpu.memory_space<vmem>>, vector<16x1xf32>
      %138 = vector.broadcast %137 : vector<16x1xf32> to vector<16x256xf32>
      %139 = arith.addf %127, %138 : vector<16x256xf32>
      %c0_40 = arith.constant 0 : index
      %c0_41 = arith.constant 0 : index
      %140 = vector.load %arg11[%c0_40, %c0_41] : memref<16x256xf32, #tpu.memory_space<vmem>>, vector<16x256xf32>
      tpu.vector_store %arg11[%c0_40, %c0_41], %139 {strides = array<i32>} : memref<16x256xf32, #tpu.memory_space<vmem>>, vector<16x256xf32>,
    } else {
    }
    %c0_i32_34 = arith.constant 0 : i32
    %131 = arith.cmpi sgt, %arg1, %c0_i32_34 : i32
    %132 = arith.extui %131 : i1 to i32
    %c0_i32_35 = arith.constant 0 : i32
    %133 = arith.cmpi ne, %132, %c0_i32_35 : i32
    scf.if %133 {
      %c0_38 = arith.constant 0 : index
      %c0_39 = arith.constant 0 : index
      %137 = vector.load %arg11[%c0_38, %c0_39] : memref<16x256xf32, #tpu.memory_space<vmem>>, vector<16x256xf32>
      %138 = arith.addf %137, %127 : vector<16x256xf32>
      %c0_40 = arith.constant 0 : index
      %c0_41 = arith.constant 0 : index
      %139 = vector.load %arg11[%c0_40, %c0_41] : memref<16x256xf32, #tpu.memory_space<vmem>>, vector<16x256xf32>
      tpu.vector_store %arg11[%c0_40, %c0_41], %138 {strides = array<i32>} : memref<16x256xf32, #tpu.memory_space<vmem>>, vector<16x256xf32>,
    } else {
    }
    %c0_i32_36 = arith.constant 0 : i32
    %134 = arith.cmpi eq, %arg1, %c0_i32_36 : i32
    %135 = arith.extui %134 : i1 to i32
    %c0_i32_37 = arith.constant 0 : i32
    %136 = arith.cmpi ne, %135, %c0_i32_37 : i32
    scf.if %136 {
      %c0_38 = arith.constant 0 : index
      %c0_39 = arith.constant 0 : index
      %137 = vector.load %arg11[%c0_38, %c0_39] : memref<16x256xf32, #tpu.memory_space<vmem>>, vector<16x256xf32>
      %c0_40 = arith.constant 0 : index
      %c0_41 = arith.constant 0 : index
      %c0_42 = arith.constant 0 : index
      %138 = vector.load %arg10[%c0_40, %c0_41, %c0_42] : memref<1x16x256xf32, #tpu.memory_space<vmem>>, vector<1x16x256xf32>
      %139 = vector.shape_cast %138 : vector<1x16x256xf32> to vector<16x256xf32>
      %140 = vector.shape_cast %137 : vector<16x256xf32> to vector<1x16x256xf32>
      tpu.vector_store %arg10[%c0_40, %c0_41, %c0_42], %140 {strides = array<i32>} : memref<1x16x256xf32, #tpu.memory_space<vmem>>, vector<1x16x256xf32>,
    } else {
    }
    return
  }
  func.func @transform_0(%arg0: i32, %arg1: i32) -> (i32, i32) {
    %c0_i32 = arith.constant 0 : i32
    %c0_i32_0 = arith.constant 0 : i32
    %c0_i32_1 = arith.constant 0 : i32
    return %c0_i32, %c0_i32_0 : i32, i32
  }
  func.func @transform_1(%arg0: i32, %arg1: i32) -> (i32, i32, i32) {
    %c0_i32 = arith.constant 0 : i32
    %c0_i32_0 = arith.constant 0 : i32
    %c0_i32_1 = arith.constant 0 : i32
    return %arg0, %c0_i32, %c0_i32_0 : i32, i32, i32
  }
  func.func @transform_2(%arg0: i32, %arg1: i32) -> (i32, i32, i32) {
    %c0_i32 = arith.constant 0 : i32
    %c0_i32_0 = arith.constant 0 : i32
    %c0_i32_1 = arith.constant 0 : i32
    return %arg1, %c0_i32, %c0_i32_0 : i32, i32, i32
  }
  func.func @transform_3(%arg0: i32, %arg1: i32) -> (i32, i32, i32) {
    %c0_i32 = arith.constant 0 : i32
    %c0_i32_0 = arith.constant 0 : i32
    %c0_i32_1 = arith.constant 0 : i32
    return %arg1, %c0_i32, %c0_i32_0 : i32, i32, i32
  }
  func.func @transform_4(%arg0: i32, %arg1: i32) -> (i32, i32, i32) {
    %c0_i32 = arith.constant 0 : i32
    %c0_i32_0 = arith.constant 0 : i32
    %c0_i32_1 = arith.constant 0 : i32
    return %arg1, %c0_i32, %c0_i32_0 : i32, i32, i32
  }
  func.func @transform_5(%arg0: i32, %arg1: i32) -> (i32, i32, i32) {
    %c0_i32 = arith.constant 0 : i32
    %c0_i32_0 = arith.constant 0 : i32
    %c0_i32_1 = arith.constant 0 : i32
    return %arg1, %c0_i32, %c0_i32_0 : i32, i32, i32
  }
  func.func @transform_6(%arg0: i32, %arg1: i32) -> (i32, i32, i32) {
    %c0_i32 = arith.constant 0 : i32
    %c0_i32_0 = arith.constant 0 : i32
    %c0_i32_1 = arith.constant 0 : i32
    return %arg1, %c0_i32, %c0_i32_0 : i32, i32, i32
  }
  func.func @transform_7(%arg0: i32, %arg1: i32) -> (i32, i32) {
    %c0_i32 = arith.constant 0 : i32
    %c0_i32_0 = arith.constant 0 : i32
    %c0_i32_1 = arith.constant 0 : i32
    return %c0_i32, %c0_i32_0 : i32, i32
  }
  func.func @transform_8(%arg0: i32, %arg1: i32) -> (i32, i32, i32) {
    %c0_i32 = arith.constant 0 : i32
    %c0_i32_0 = arith.constant 0 : i32
    %c0_i32_1 = arith.constant 0 : i32
    return %arg0, %c0_i32, %c0_i32_0 : i32, i32, i32
  }
}

</mosaic_0001>

<bundles_post_ra>
// kernel: tpu_custom_call.1
= control target key start
LH: loop header
LB: loop body
LE: loop exit
PB: predicated region body
PF: predicated region fallthrough
CT: control target
= control target key end

     0   :  { %13 = vsyncpa [#allocation4], 0  ;;  %s4844_s0 = inlined_call_operand.vmem [shape: bf16[9,256], index: 0, kind: input, shape index: {}]   ;;  %s4845_s1 = inlined_call_operand.vmem [shape: bf16[2,16,256], index: 1, kind: input, shape index: {}]   ;;  %s4846_s2 = inlined_call_operand.vmem [shape: bf16[1,64,16], index: 2, kind: input, shape index: {}]   ;;  %s4847_s3 = inlined_call_operand.vmem [shape: f32[1,64,1], index: 3, kind: input, shape index: {}]   ;;  %s4848_s4 = inlined_call_operand.vmem [shape: f32[1,64,9], index: 4, kind: input, shape index: {}]   ;;  %s4849_s5 = inlined_call_operand.vmem [shape: f32[1,64,1], index: 5, kind: input, shape index: {}]   ;;  %s4850_s6 = inlined_call_operand.vmem [shape: bf16[1,16,32], index: 6, kind: input, shape index: {}]   ;;  %s4851_s7 = inlined_call_operand.vmem [shape: f32[16,1], index: 7, kind: input, shape index: {}]   ;;  %s4852_s8 = inlined_call_operand.hbm [shape: f32[2,16,256], index: 8, kind: output, shape index: {}]  }
   0x1   :  { %15 = vsyncpa [#allocation4 + $0x1], 0  ;;  %s2655_s27 = smov 0   ;;  %s2657_s28 = smov 0  }
   0x2   :  { %s2659_s29 = smov 0   ;;  %s2661_s30 = smov 0  }
   0x3   :  { %s2663_s9 = smov 0   ;;  %s2665_s10 = smov 0  }
   0x4 LB: > { %s2307_s11 = sadd.s32 4294967295, %s2589_s10   ;;  %s2308_s12 = sadd.s32 4294967294, %s2589_s10   ;;  %s2589_s10 = sphi %s2665_s10, %s21_s10   ;;  %s2585_s9 = sphi %s2663_s9, %s5324_s9   ;;  %s2581_s30 = sphi %s2661_s30, %s5323_s30   ;;  %s2577_s29 = sphi %s2659_s29, %s5322_s29   ;;  %s2573_s28 = sphi %s2657_s28, %s5321_s28   ;;  %s2569_s27 = sphi %s2655_s27, %s5320_s27  }
   0x5   : > { %s33_s13 = sadd.s32 1, %s2585_s9  ;;  %s238_s14 = sadd.s32 1, %s2577_s29 }
   0x6   : > { %p35_p0 = scmp.ge.s32.totalorder %s33_s13, 2  ;;  %p248_p1 = scmp.ne.s32.totalorder %s2577_s29, %s2573_s28 }
   0x7   : > { %p249_p2 = scmp.eq.s32.totalorder %s2307_s11, 1  ;;  %p254_p3 = scmp.ne.s32.totalorder %s2573_s28, %s2569_s27 }
   0x8   : > { %s5326_s13 = smov (%p35_p0, %s33_s13), 0  ;;  %p255_p5 = scmp.eq.s32.totalorder %s2308_s12, 1 }
   0x9   : > { %p2695_p4 = por %p249_p2, %p248_p1  ;;  %s235_s16 = ssub.s32 %s2585_s9, %s5326_s13 }
   0xa   : > { %p2316_p6 = scmp.ge.s32.totalorder %s2589_s10, 1  ;;  %p236_p7 = scmp.eq.s32.totalorder %s235_s16, 0 }
   0xb   : > { %p2702_p8 = por %p255_p5, %p254_p3  ;;  %p327_p9 = scmp.lt.s32.totalorder %s2589_s10, 3 }
   0xc   : > { %s2708_s18 = scalar_select %p236_p7, %s2577_s29, %s238_s14  }
   0xd   : > { %p328_p10 = pnand %p2316_p6, %p327_p9 }
   0xf   : > { %331 = sbr.rel (%p328_p10) target bundleno = 969 (0x3c9), region = 52 }
  0x14   : > { %v429_v0 = vld [vmem:[%s4847_s3 + $0x10] sm:$0xff]  ;;  %p386_p11 = scmp.lt.s32.totalorder %s2581_s30, 1  ;;  %v4857_v1 = vmov 0   ;;  %v430_v2 = vld [vmem:[%s4847_s3 + $0x18] sm:$0xff]  ;;  %v432_v4 = vld [vmem:[%s4847_s3 + $0x28] sm:$0xff]  ;;  %vm505_vm0 = vcmask 130048  }
  0x15   : > { %2431 = vset.pattern.permute.xlu1 %v4857_v1  ;;  %550 = vmatprep.mubr.bf16.mxu0 %v4857_v1  ;;  %v2473_v6 = vld [vmem:[%s4846_s2] sm:$0xff]   ;;  %v2474_v7 = vld [vmem:[%s4846_s2 + $0x18] sm:$0xff]   ;;  %v428_v10 = vld [vmem:[%s4847_s3 + $0x8] sm:$0xff]  ;;  %v2592_v19 = vmov 1   ;;  %v2593_v23 = vmov 2   ;;  %v4855_v25 = vmov 3  }
  0x16   : > { %447 = vperm.xlu1 %2431, %v429_v0   ;;  %s387_s21 = scalar_select %p386_p11, %s2581_s30, 1  ;;  %580 = vmatprep.mubr.bf16.mxu1 %v4857_v1  ;;  %v427_v8 = vld [vmem:[%s4847_s3] sm:$0xff]  ;;  %v434_v9 = vld [vmem:[%s4847_s3 + $0x38] sm:$0xff]  ;;  %v2750_v11 = vld [vmem:[%s4848_s4 + $0x8] sm:$0xff]  ;;  %v4853_v26 = vmov 4   ;;  %v4863_v27 = vmov 5  }
  0x17   : > { %2430 = vset.pattern.permute.xlu0 %v4857_v1  ;;  %v431_v12 = vld [vmem:[%s4847_s3 + $0x20] sm:$0xff]  ;;  %v2475_v13 = vld [vmem:[%s4846_s2 + $0x8] sm:$0xff]   ;;  %v2762_v14 = vld [vmem:[%s4848_s4 + $0x18] sm:$0xff]  ;;  %s2597_s12 = smov 15   ;;  %s2598_s14 = smov 17   ;;  %v4861_v45 = vmov 6  }
  0x18   : > { %s2353_s24 = sshll.u32 %s387_s21, 4  ;;  %437 = vperm.xlu0 %2430, %v427_v8   ;;  %v433_v15 = vld [vmem:[%s4847_s3 + $0x30] sm:$0xff]  ;;  %v2773_v16 = vld [vmem:[%s4848_s4 + $0x28] sm:$0xff]  ;;  %v2782_v18 = vld [vmem:[%s4848_s4] sm:$0xff]  ;;  %s2600_s16 = smov 16   ;;  %v4859_v54 = vmov 8  }
  0x19   : > { %s390_s11 = scalar_lea.vmem %s4845_s1, %s2353_s24  ;;  %v2476_v17 = vld [vmem:[%s4846_s2 + $0x10] sm:$0xff]   ;;  %v2787_v20 = vld [vmem:[%s4848_s4 + $0x38] sm:$0xff]  ;;  %v2805_v22 = vld [vmem:[%s4848_s4 + $0x20] sm:$0xff]  ;;  %s2601_s19 = smov 1  }
  0x1a   : > { %452 = vperm.xlu1 %2431, %v430_v2   ;;  %v2470_v3 = vld [vmem:[%s390_s11 + $0x4] ss:$8 sps:$4 sm:$0xff]   ;;  %v2472_v5 = vld [vmem:[%s390_s11] ss:$8 sps:$4 sm:$0xff]   ;;  %v2798_v21 = vld [vmem:[%s4848_s4 + $0x10] sm:$0xff]  ;;  %s2603_s20 = smov 127  }
  0x1b   : > { %532 = vmatprep.subr.bf16.mxu0 %v2470_v3  ;;  %2355 = vmatprep.subr.bf16.mxu1 %v2470_v3  ;;  %v2811_v24 = vld [vmem:[%s4848_s4 + $0x30] sm:$0xff]  ;;  %s2604_s22 = smov 113   ;;  %s2606_s21 = smov 112  }
  0x1c   : > { %533 = vmatpush1.bf16.msra.mxu0 %v2472_v5  ;;  %2356 = vmatpush1.bf16.msra.mxu1 %v2472_v5  ;;  %s2607_s23 = smov 111   ;;  %s2354_s24 = sshll.u32 %s2581_s30, 9 }
  0x1d   : > { %442 = vperm.xlu0 %2430, %v428_v10   ;;  %s2608_s30 = smov [#allocation3]  }
  0x1e   : > { %462 = vperm.xlu1 %2431, %v432_v4   ;;  %s2517_s11 = sshll.u32 %s2608_s30, 4  ;;  %s2518_s11 = int_to_ptr.vmem [resolvable:$false] %s2517_s11 }
  0x1f   : > { %2326 = vmatmul.mubr.msk.bf16.vlgmr.msra.gmra.mxu0 %vm505_vm0, %v2473_v6  ;;  %2329 = vmatmul.mubr.msk.bf16.vlgmr.msra.gmra.mxu1 %vm505_vm0, %v2474_v7 }
  0x20   : > { %560 = vmatprep.mubr.bf16.mxu0 %v4857_v1  ;;  %2086 = vmatprep.mubr.bf16.mxu1 %v4857_v1 }
  0x21   : > { %457 = vperm.xlu0 %2430, %v431_v12  }
  0x22   : > { %472 = vperm.xlu1 %2431, %v434_v9  }
  0x25   : > { %467 = vperm.xlu0 %2430, %v433_v15  }
  0x26   : > { %687 = vperm.xlu1 %2431, %v2750_v11  }
  0x27   : > { %2327 = vmatmul.mubr.msk.bf16.gmra.mxu0 %vm505_vm0, %v2475_v13 }
  0x28   : > { %570 = vmatprep.mubr.bf16.mxu0 %v4857_v1 }
  0x29   : > { %2432 = vset.pattern.permute.xlu0 %v2592_v19 }
  0x2a   : > { %697 = vperm.xlu1 %2431, %v2762_v14   ;;  %826 = vperm.xlu0 %2432, %v2782_v18  }
  0x2e   : > { %707 = vperm.xlu1 %2431, %v2773_v16   ;;  %838 = vperm.xlu0 %2432, %v2762_v14  }
  0x2f   : > { %2328 = vmatmul.mubr.msk.bf16.gmra.mxu0 %vm505_vm0, %v2476_v17 }
  0x32   : > { %717 = vperm.xlu1 %2431, %v2787_v20   ;;  %846 = vperm.xlu0 %2432, %v2773_v16  }
  0x36   : > { %2433 = vset.pattern.permute.xlu1 %v2592_v19  ;;  %854 = vperm.xlu0 %2432, %v2787_v20  }
  0x37   : > { %830 = vperm.xlu1 %2433, %v2750_v11  }
  0x3a   : > { %2435 = vset.pattern.permute.xlu0 %v2593_v23 }
  0x3b   : > { %834 = vperm.xlu1 %2433, %v2798_v21   ;;  %967 = vperm.xlu0 %2435, %v2750_v11  }
  0x3f   : > { %842 = vperm.xlu1 %2433, %v2805_v22   ;;  %979 = vperm.xlu0 %2435, %v2805_v22  }
  0x43   : > { %850 = vperm.xlu1 %2433, %v2811_v24   ;;  %987 = vperm.xlu0 %2435, %v2811_v24  }
  0x47   : > { %2434 = vset.pattern.permute.xlu1 %v2593_v23  ;;  %2444 = vset.pattern.permute.xlu0 %v4859_v54 }
  0x48   : > { %963 = vperm.xlu1 %2434, %v2782_v18  }
  0x4c   : > { %971 = vperm.xlu1 %2434, %v2798_v21  }
  0x50   : > { %975 = vperm.xlu1 %2434, %v2762_v14  }
  0x54   : > { %983 = vperm.xlu1 %2434, %v2773_v16  }
  0x58   : > { %991 = vperm.xlu1 %2434, %v2787_v20  }
  0x5c   : > { %2436 = vset.pattern.permute.xlu1 %v4855_v25 }
  0x5d   : > { %1104 = vperm.xlu1 %2436, %v2750_v11  }
  0x61   : > { %1108 = vperm.xlu1 %2436, %v2798_v21  }
  0x65   : > { %1116 = vperm.xlu1 %2436, %v2805_v22  }
  0x69   : > { %2437 = vset.pattern.permute.xlu1 %v4853_v26 }
  0x6a   : > { %1176 = vperm.xlu1 %2437, %v2762_v14  }
  0x6e   : > { %2438 = vset.pattern.permute.xlu1 %v4863_v27 }
  0x6f   : > { %1309 = vperm.xlu1 %2438, %v2798_v21  }
  0x73   : > { %2439 = vset.pattern.permute.xlu1 %v4853_v26 }
  0x74   : > { %1164 = vperm.xlu1 %2439, %v2782_v18  }
  0x78   : > { %1168 = vperm.xlu1 %2439, %v2750_v11  }
  0x7c   : > { %2440 = vset.pattern.permute.xlu1 %v4861_v45 }
  0x91   : > { %v2833_v28 = vpop.permute.xlu1 %447 }
  0x93   : > { %v438_v30 = vpop.permute.xlu0 %437 }
  0x95   : > { %v2835_v29 = vpop.permute.xlu1 %452 }
  0x98   : > { %v443_v32 = vpop.permute.xlu0 %442 }
  0x99   : > { %v2837_v31 = vpop.permute.xlu1 %462 }
  0x9c   : > { %v2839_v34 = vpop.permute.xlu0 %457 }
  0x9d   : > { %v473_v33 = vpop.permute.xlu1 %472 }
  0xa0   : > { %v468_v39 = vpop.permute.xlu0 %467 }
  0xa1   : > { %v2841_v35 = vpop.permute.xlu1 %687 }
  0xa5   : > { %v2849_v40 = vpop.permute.xlu1 %697  ;;  %v2970_v10 = vpop.permute.xlu0 %826 }
  0xa6   : > { %5011 = vst [vmem:[#allocation6_spill] sm:$0xff] %v2849_v40 }
  0xa9   : > { %v2860_v46 = vpop.permute.xlu1 %707  ;;  %v2978_v13 = vpop.permute.xlu0 %838 }
  0xaa   : > { %5013 = vst [vmem:[#allocation8_spill] sm:$0xff] %v2860_v46  ;;  %5028 = vst [vmem:[#allocation23_spill] sm:$0xff] %v2978_v13 }
  0xad   : > { %v2872_v49 = vpop.permute.xlu1 %717  ;;  %v2990_v19 = vpop.permute.xlu0 %846 }
  0xae   : > { %5015 = vst [vmem:[#allocation10_spill] sm:$0xff] %v2872_v49  ;;  %5030 = vst [vmem:[#allocation25_spill] sm:$0xff] %v2990_v19 }
  0xb2   : > { %v2882_v53 = vpop.permute.xlu1 %830 }
  0xb3   : > { %5017 = vst [vmem:[#allocation12_spill] sm:$0xff] %v2882_v53 }
  0xb6   : > { %v2893_v55 = vpop.permute.xlu1 %834 }
  0xb7   : > { %5018 = vst [vmem:[#allocation13_spill] sm:$0xff] %v2893_v55 }
  0xba   : > { %v2899_v56 = vpop.permute.xlu1 %842 }
  0xbb   : > { %5019 = vst [vmem:[#allocation14_spill] sm:$0xff] %v2899_v56  ;;  %v4876_v56 = vmov 7  }
  0xbe   : > { %v2909_v58 = vpop.permute.xlu1 %850 }
  0xc3   : > { %v2919_v62 = vpop.permute.xlu1 %963 }
  0xc7   : > { %v2929_v63 = vpop.permute.xlu1 %971 }
  0xc8   : > { %5021 = vst [vmem:[#allocation16_spill] sm:$0xff] %v2929_v63 }
  0xcb   : > { %v2935_v0 = vpop.permute.xlu1 %975 }
  0xcc   : > { %5022 = vst [vmem:[#allocation17_spill] sm:$0xff] %v2935_v0 }
  0xcf   : > { %v2945_v3 = vpop.permute.xlu1 %983 }
  0xd0   : > { %5023 = vst [vmem:[#allocation18_spill] sm:$0xff] %v2945_v3 }
  0xd3   : > { %v2957_v8 = vpop.permute.xlu1 %991 }
  0xd4   : > { %5026 = vst [vmem:[#allocation21_spill] sm:$0xff] %v2957_v8 }
  0xd8   : > { %v2972_v12 = vpop.permute.xlu1 %1104 }
  0xd9   : > { %5027 = vst [vmem:[#allocation22_spill] sm:$0xff] %v2972_v12 }
  0xdc   : > { %v2980_v15 = vpop.permute.xlu1 %1108 }
  0xdd   : > { %5029 = vst [vmem:[#allocation24_spill] sm:$0xff] %v2980_v15  ;;  %v5039_v15 = vmov 5  }
  0xdf   : > { %v552_v36 = vpop.f32.mrf.mxu0  ;;  %v582_v38 = vpop.f32.mrf.mxu1 }
  0xe0   : > { %v2843_v37 = vadd.f32 %v552_v36, %v438_v30  ;;  %v2851_v41 = vadd.f32 %v582_v38, %v468_v39  ;;  %v2992_v23 = vpop.permute.xlu1 %1116 }
  0xe1   : > { %v554_v42 = vpop.f32.mrf.mxu0  ;;  %v584_v44 = vpop.f32.mrf.mxu1  ;;  %5031 = vst [vmem:[#allocation26_spill] sm:$0xff] %v2992_v23 }
  0xe2   : > { %889 = vrot.lane.b32.xlu1 %v2843_v37, %s2597_s12  ;;  %605 = vrot.lane.b32.xlu0 %v2843_v37, %s2598_s14  ;;  %5012 = vst [vmem:[#allocation7_spill] sm:$0xff] %v2851_v41  ;;  %v2857_v43 = vadd.f32 %v554_v42, %v438_v30  ;;  %v2866_v47 = vadd.f32 %v584_v44, %v468_v39  ;;  %v3001_v30 = vpop.permute.xlu0 %854 }
  0xe3   : > { %v556_v48 = vpop.f32.mrf.mxu0  ;;  %v586_v51 = vpop.f32.mrf.mxu1  ;;  %5032 = vst [vmem:[#allocation27_spill] sm:$0xff] %v3001_v30 }
  0xe4   : > { %5014 = vst [vmem:[#allocation9_spill] sm:$0xff] %v2866_v47  ;;  %v2874_v50 = vadd.f32 %v556_v48, %v443_v32  ;;  %v2880_v52 = vadd.f32 %v586_v51, %v473_v33 }
  0xe5   : > { %v558_v57 = vpop.f32.mrf.mxu0  ;;  %v588_v60 = vpop.f32.mrf.mxu1 }
  0xe6   : > { %901 = vrot.lane.b32.xlu1 %v2851_v41, %s2597_s12  ;;  %617 = vrot.lane.b32.xlu0 %v2851_v41, %s2598_s14  ;;  %5016 = vst [vmem:[#allocation11_spill] sm:$0xff] %v2880_v52  ;;  %v2911_v59 = vadd.f32 %v558_v57, %v443_v32  ;;  %v2917_v61 = vadd.f32 %v588_v60, %v473_v33  ;;  %v3003_v32 = vpop.permute.xlu1 %1176 }
  0xe7   : > { %v562_v2 = vpop.f32.mrf.mxu0 }
  0xe8   : > { %5020 = vst [vmem:[#allocation15_spill] sm:$0xff] %v2917_v61  ;;  %v2948_v4 = vadd.f32 %v562_v2, %v2833_v28 }
  0xe9   : > { %v564_v5 = vpop.f32.mrf.mxu0 }
  0xea   : > { %905 = vrot.lane.b32.xlu1 %v2857_v43, %s2597_s12  ;;  %752 = vrot.lane.b32.xlu0 %v2843_v37, %s2600_s16  ;;  %5024 = vst [vmem:[#allocation19_spill] sm:$0xff] %v2948_v4  ;;  %v2955_v6 = vadd.f32 %v564_v5, %v2833_v28  ;;  %v3015_v33 = vpop.permute.xlu1 %1309 }
  0xeb   : > { %v566_v7 = vpop.f32.mrf.mxu0  ;;  %5034 = vst [vmem:[#allocation29_spill] sm:$0xff] %v3015_v33 }
  0xec   : > { %5025 = vst [vmem:[#allocation20_spill] sm:$0xff] %v2955_v6  ;;  %v2964_v9 = vadd.f32 %v566_v7, %v2835_v29 }
  0xed   : > { %v568_v17 = vpop.f32.mrf.mxu0 }
  0xee   : > { %917 = vrot.lane.b32.xlu1 %v2866_v47, %s2597_s12  ;;  %764 = vrot.lane.b32.xlu0 %v2851_v41, %s2600_s16  ;;  %v2995_v28 = vadd.f32 %v568_v17, %v2835_v29  ;;  %v3013_v29 = vpop.permute.xlu0 %967 }
  0xef   : > { %5033 = vst [vmem:[#allocation28_spill] sm:$0xff] %v3013_v29  ;;  %v572_v36 = vpop.f32.mrf.mxu0  ;;  %v3026_v44 = vpop.permute.xlu1 %1164 }
  0xf0   : > { %v3022_v38 = vadd.f32 %v572_v36, %v2839_v34 }
  0xf1   : > { %v574_v42 = vpop.f32.mrf.mxu0 }
  0xf2   : > { %607 = vrot.lane.b32.xlu1 %v2874_v50, %s2598_s14  ;;  %1026 = vrot.lane.b32.xlu0 %v2843_v37, %s2601_s19  ;;  %5035 = vst [vmem:[#allocation30_spill] sm:$0xff] %v3022_v38  ;;  %v3024_v39 = vpop.permute.xlu0 %979  ;;  %v3033_v48 = vadd.f32 %v574_v42, %v2839_v34 }
  0xf3   : > { %5036 = vst [vmem:[#allocation31_spill] sm:$0xff] %v3024_v39  ;;  %v576_v51 = vpop.f32.mrf.mxu0  ;;  %v3041_v60 = vpop.permute.xlu1 %1168 }
  0xf4   : > { %v3044_v2 = vadd.f32 %v576_v51, %v2837_v31 }
  0xf5   : > { %v578_v36 = vpop.f32.mrf.mxu0 }
  0xf6   : > { %619 = vrot.lane.b32.xlu1 %v2880_v52, %s2598_s14  ;;  %1038 = vrot.lane.b32.xlu0 %v2851_v41, %s2601_s19  ;;  %v3039_v57 = vpop.permute.xlu0 %987  ;;  %5037 = vst [vmem:[#allocation32_spill] sm:$0xff] %v3044_v2  ;;  %v3067_v42 = vadd.f32 %v578_v36, %v2837_v31 }
  0xf8   : > { %5038 = vst [vmem:[#allocation33_spill] sm:$0xff] %v3067_v42 }
  0xfa   : > { %754 = vrot.lane.b32.xlu1 %v2874_v50, %s2600_s16  ;;  %621 = vrot.lane.b32.xlu0 %v2857_v43, %s2598_s14 }
  0xfe   : > { %766 = vrot.lane.b32.xlu1 %v2880_v52, %s2600_s16  ;;  %633 = vrot.lane.b32.xlu0 %v2866_v47, %s2598_s14 }
 0x102   : > { %1028 = vrot.lane.b32.xlu1 %v2874_v50, %s2601_s19  ;;  %768 = vrot.lane.b32.xlu0 %v2857_v43, %s2600_s16 }
 0x106   : > { %1040 = vrot.lane.b32.xlu1 %v2880_v52, %s2601_s19  ;;  %780 = vrot.lane.b32.xlu0 %v2866_v47, %s2600_s16 }
 0x10a   : > { %623 = vrot.lane.b32.xlu1 %v2911_v59, %s2598_s14  ;;  %1042 = vrot.lane.b32.xlu0 %v2857_v43, %s2601_s19 }
 0x10e   : > { %635 = vrot.lane.b32.xlu1 %v2917_v61, %s2598_s14  ;;  %1054 = vrot.lane.b32.xlu0 %v2866_v47, %s2601_s19 }
 0x112   : > { %770 = vrot.lane.b32.xlu1 %v2911_v59, %s2600_s16  ;;  %891 = vrot.lane.b32.xlu0 %v2874_v50, %s2597_s12 }
 0x116   : > { %782 = vrot.lane.b32.xlu1 %v2917_v61, %s2600_s16  ;;  %903 = vrot.lane.b32.xlu0 %v2880_v52, %s2597_s12 }
 0x11a   : > { %1044 = vrot.lane.b32.xlu1 %v2911_v59, %s2601_s19  ;;  %907 = vrot.lane.b32.xlu0 %v2911_v59, %s2597_s12 }
 0x11e   : > { %1056 = vrot.lane.b32.xlu1 %v2917_v61, %s2601_s19  ;;  %919 = vrot.lane.b32.xlu0 %v2917_v61, %s2597_s12 }
 0x122   : > { %893 = vrot.lane.b32.xlu1 %v2948_v4, %s2597_s12  ;;  %609 = vrot.lane.b32.xlu0 %v2948_v4, %s2598_s14 }
 0x126   : > { %909 = vrot.lane.b32.xlu1 %v2955_v6, %s2597_s12  ;;  %756 = vrot.lane.b32.xlu0 %v2948_v4, %s2600_s16 }
 0x12a   : > { %611 = vrot.lane.b32.xlu1 %v2964_v9, %s2598_s14  ;;  %1030 = vrot.lane.b32.xlu0 %v2948_v4, %s2601_s19 }
 0x12e   : > { %758 = vrot.lane.b32.xlu1 %v2964_v9, %s2600_s16  ;;  %1231 = vrot.lane.b32.xlu0 %v2948_v4, %s2603_s20 }
 0x132   : > { %1032 = vrot.lane.b32.xlu1 %v2964_v9, %s2601_s19  ;;  %625 = vrot.lane.b32.xlu0 %v2955_v6, %s2598_s14 }
 0x136   : > { %1233 = vrot.lane.b32.xlu1 %v2964_v9, %s2603_s20  ;;  %772 = vrot.lane.b32.xlu0 %v2955_v6, %s2600_s16 }
 0x13a   : > { %627 = vrot.lane.b32.xlu1 %v2995_v28, %s2598_s14  ;;  %1046 = vrot.lane.b32.xlu0 %v2955_v6, %s2601_s19 }
 0x13e   : > { %774 = vrot.lane.b32.xlu1 %v2995_v28, %s2600_s16  ;;  %1247 = vrot.lane.b32.xlu0 %v2955_v6, %s2603_s20 }
 0x142   : > { %1048 = vrot.lane.b32.xlu1 %v2995_v28, %s2601_s19  ;;  %895 = vrot.lane.b32.xlu0 %v2964_v9, %s2597_s12 }
 0x146   : > { %1249 = vrot.lane.b32.xlu1 %v2995_v28, %s2603_s20  ;;  %911 = vrot.lane.b32.xlu0 %v2995_v28, %s2597_s12 }
 0x14a   : > { %897 = vrot.lane.b32.xlu1 %v3022_v38, %s2597_s12  ;;  %613 = vrot.lane.b32.xlu0 %v3022_v38, %s2598_s14 }
 0x14e   : > { %913 = vrot.lane.b32.xlu1 %v3033_v48, %s2597_s12  ;;  %760 = vrot.lane.b32.xlu0 %v3022_v38, %s2600_s16 }
 0x152   : > { %615 = vrot.lane.b32.xlu1 %v3044_v2, %s2598_s14  ;;  %1034 = vrot.lane.b32.xlu0 %v3022_v38, %s2601_s19 }
 0x154   : > { %v3050_v34 = vpop.permute.xlu1 %889  ;;  %v3052_v5 = vpop.permute.xlu0 %605 }
 0x156   : > { %762 = vrot.lane.b32.xlu1 %v3044_v2, %s2600_s16  ;;  %629 = vrot.lane.b32.xlu0 %v3033_v48, %s2598_s14 }
 0x158   : > { %v3058_v7 = vpop.permute.xlu1 %901  ;;  %v3060_v17 = vpop.permute.xlu0 %617 }
 0x15a   : > { %1036 = vrot.lane.b32.xlu1 %v3044_v2, %s2601_s19  ;;  %776 = vrot.lane.b32.xlu0 %v3033_v48, %s2600_s16 }
 0x15c   : > { %v3069_v51 = vpop.permute.xlu1 %905  ;;  %v3071_v26 = vpop.permute.xlu0 %752 }
 0x15e   : > { %631 = vrot.lane.b32.xlu1 %v3067_v42, %s2598_s14  ;;  %1050 = vrot.lane.b32.xlu0 %v3033_v48, %s2601_s19 }
 0x160   : > { %v3077_v25 = vpop.permute.xlu1 %917  ;;  %v3079_v1 = vpop.permute.xlu0 %764 }
 0x162   : > { %778 = vrot.lane.b32.xlu1 %v3067_v42, %s2600_s16  ;;  %899 = vrot.lane.b32.xlu0 %v3044_v2, %s2597_s12 }
 0x164   : > { %v3085_v31 = vpop.permute.xlu1 %607  ;;  %v3087_v36 = vpop.permute.xlu0 %1026 }
 0x166   : > { %1052 = vrot.lane.b32.xlu1 %v3067_v42, %s2601_s19  ;;  %915 = vrot.lane.b32.xlu0 %v3067_v42, %s2597_s12  ;;  %s383_s12 = sand.u32 1, %s2573_s28  }
 0x168   : > { %v3093_v54 = vpop.permute.xlu1 %619  ;;  %v3095_v45 = vpop.permute.xlu0 %1038 }
 0x16a   : > { %1450 = vperm.xlu1 %2440, %v2762_v14   ;;  %1384 = vrot.lane.b32.xlu0 %v2955_v6, %s2604_s22 }
 0x16c   : > { %v3100_v27 = vpop.permute.xlu1 %754  ;;  %v3102_v33 = vpop.permute.xlu0 %621 }
 0x16e   : > { %2441 = vset.pattern.permute.xlu1 %v5039_v15  ;;  %1229 = vrot.lane.b32.xlu0 %v2874_v50, %s2603_s20 }
 0x16f   : > { %1301 = vperm.xlu1 %2441, %v2782_v18  }
 0x170   : > { %v3108_v3 = vpop.permute.xlu1 %766  ;;  %v3110_v23 = vpop.permute.xlu0 %633 }
 0x171   : > { %5040 = vst [vmem:[#allocation34_spill] sm:$0xff] %v3108_v3 }
 0x172   : > { %1245 = vrot.lane.b32.xlu0 %v2911_v59, %s2603_s20 }
 0x173   : > { %1368 = vrot.lane.b32.xlu1 %v2948_v4, %s2604_s22 }
 0x174   : > { %v3116_v19 = vpop.permute.xlu1 %1028  ;;  %v3118_v46 = vpop.permute.xlu0 %768  ;;  %2442 = vset.pattern.permute.xlu1 %v4876_v56 }
 0x175   : > { %5041 = vst [vmem:[#allocation35_spill] sm:$0xff] %v3116_v19 }
 0x176   : > { %1521 = vrot.lane.b32.xlu0 %v2955_v6, %s2606_s21 }
 0x177   : > { %1370 = vrot.lane.b32.xlu1 %v2964_v9, %s2604_s22 }
 0x178   : > { %v3125_v39 = vpop.permute.xlu1 %1040  ;;  %v3127_v55 = vpop.permute.xlu0 %780 }
 0x179   : > { %5042 = vst [vmem:[#allocation36_spill] sm:$0xff] %v3125_v39  ;;  %v5044_v39 = vmov 6  }
 0x17a   : > { %1720 = vperm.xlu0 %2444, %v2798_v21  }
 0x17b   : > { %1386 = vrot.lane.b32.xlu1 %v2995_v28, %s2604_s22 }
 0x17c   : > { %v3132_v63 = vpop.permute.xlu1 %623  ;;  %v3134_v8 = vpop.permute.xlu0 %1042 }
 0x17e   : > { %1366 = vrot.lane.b32.xlu0 %v2874_v50, %s2604_s22 }
 0x17f   : > { %1587 = vperm.xlu1 %2442, %v2762_v14  }
 0x180   : > { %v3139_v56 = vpop.permute.xlu1 %635  ;;  %v3141_v0 = vpop.permute.xlu0 %1054 }
 0x182   : > { %1382 = vrot.lane.b32.xlu0 %v2911_v59, %s2604_s22 }
 0x183   : > { %1227 = vrot.lane.b32.xlu1 %v2843_v37, %s2603_s20 }
 0x184   : > { %v3147_v40 = vpop.permute.xlu1 %770  ;;  %v3149_v13 = vpop.permute.xlu0 %891  ;;  %2443 = vset.pattern.permute.xlu1 %v5044_v39 }
 0x185   : > { %5043 = vst [vmem:[#allocation37_spill] sm:$0xff] %v3149_v13 }
 0x186   : > { %1658 = vrot.lane.b32.xlu0 %v2955_v6, %s2607_s23 }
 0x187   : > { %1243 = vrot.lane.b32.xlu1 %v2857_v43, %s2603_s20 }
 0x188   : > { %v3156_v29 = vpop.permute.xlu1 %782  ;;  %v3158_v12 = vpop.permute.xlu0 %903 }
 0x189   : > { %5045 = vst [vmem:[#allocation38_spill] sm:$0xff] %v3156_v29  ;;  %5046 = vst [vmem:[#allocation39_spill] sm:$0xff] %v3158_v12  ;;  %v5051_v12 = vmov 8   ;;  %v1775_v29 = vld [vmem:[%s4849_s5] sm:$0xff] }
 0x18a   : > { %1501 = vrot.lane.b32.xlu0 %v2843_v37, %s2606_s21 }
 0x18b   : > { %1438 = vperm.xlu1 %2443, %v2782_v18  }
 0x18c   : > { %v3163_v30 = vpop.permute.xlu1 %1044  ;;  %v3165_v53 = vpop.permute.xlu0 %907 }
 0x18d   : > { %5047 = vst [vmem:[#allocation40_spill] sm:$0xff] %v3163_v30  ;;  %5048 = vst [vmem:[#allocation41_spill] sm:$0xff] %v3165_v53  ;;  %v5054_v30 = vmov 0  }
 0x18e   : > { %1517 = vrot.lane.b32.xlu0 %v2857_v43, %s2606_s21 }
 0x18f   : > { %1505 = vrot.lane.b32.xlu1 %v2948_v4, %s2606_s21 }
 0x190   : > { %v3171_v6 = vpop.permute.xlu1 %1056  ;;  %v3173_v49 = vpop.permute.xlu0 %919  ;;  %2445 = vset.pattern.permute.xlu1 %v5051_v12 }
 0x191   : > { %5049 = vst [vmem:[#allocation42_spill] sm:$0xff] %v3171_v6  ;;  %5050 = vst [vmem:[#allocation43_spill] sm:$0xff] %v3173_v49 }
 0x192   : > { %1712 = vperm.xlu0 %2444, %v2782_v18  }
 0x193   : > { %1507 = vrot.lane.b32.xlu1 %v2964_v9, %s2606_s21 }
 0x194   : > { %v3179_v13 = vpop.permute.xlu1 %893  ;;  %v3181_v53 = vpop.permute.xlu0 %609 }
 0x195   : > { %5052 = vst [vmem:[#allocation44_spill] sm:$0xff] %v3179_v13  ;;  %5053 = vst [vmem:[#allocation45_spill] sm:$0xff] %v3181_v53 }
 0x196   : > { %2447 = vset.pattern.permute.xlu0 %v5054_v30 }
 0x197   : > { %1523 = vrot.lane.b32.xlu1 %v2995_v28, %s2606_s21  ;;  %682 = vperm.xlu0 %2447, %v2782_v18  }
 0x198   : > { %v3187_v6 = vpop.permute.xlu1 %909  ;;  %v3189_v49 = vpop.permute.xlu0 %756 }
 0x199   : > { %5055 = vst [vmem:[#allocation46_spill] sm:$0xff] %v3187_v6  ;;  %5056 = vst [vmem:[#allocation47_spill] sm:$0xff] %v3189_v49  ;;  %v5061_v6 = vmov 7  }
 0x19b   : > { %1724 = vperm.xlu1 %2445, %v2762_v14   ;;  %692 = vperm.xlu0 %2447, %v2798_v21  }
 0x19c   : > { %v3193_v19 = vpop.permute.xlu1 %611  ;;  %v3195_v13 = vpop.permute.xlu0 %1030 }
 0x19d   : > { %5057 = vst [vmem:[#allocation48_spill] sm:$0xff] %v3193_v19  ;;  %5058 = vst [vmem:[#allocation49_spill] sm:$0xff] %v3195_v13  ;;  %v1778_v13 = vld [vmem:[%s4849_s5 + $0x18] sm:$0xff] }
 0x19f   : > { %1364 = vrot.lane.b32.xlu1 %v2843_v37, %s2604_s22  ;;  %702 = vperm.xlu0 %2447, %v2805_v22  }
 0x1a0   : > { %v3200_v53 = vpop.permute.xlu1 %758  ;;  %v3202_v3 = vpop.permute.xlu0 %1231  ;;  %2446 = vset.pattern.permute.xlu1 %v5061_v6 }
 0x1a1   : > { %5059 = vst [vmem:[#allocation50_spill] sm:$0xff] %v3200_v53  ;;  %5060 = vst [vmem:[#allocation51_spill] sm:$0xff] %v3202_v3 }
 0x1a3   : > { %1380 = vrot.lane.b32.xlu1 %v2857_v43, %s2604_s22  ;;  %712 = vperm.xlu0 %2447, %v2811_v24  }
 0x1a4   : > { %v3208_v49 = vpop.permute.xlu1 %1032  ;;  %v3210_v19 = vpop.permute.xlu0 %625 }
 0x1a5   : > { %5062 = vst [vmem:[#allocation52_spill] sm:$0xff] %v3208_v49  ;;  %5063 = vst [vmem:[#allocation53_spill] sm:$0xff] %v3210_v19 }
 0x1a7   : > { %1575 = vperm.xlu1 %2446, %v2782_v18   ;;  %1800 = vperm.xlu0 %2447, %v1778_v13  }
 0x1a8   : > { %v3216_v53 = vpop.permute.xlu1 %1233  ;;  %v3218_v3 = vpop.permute.xlu0 %772 }
 0x1a9   : > { %5064 = vst [vmem:[#allocation54_spill] sm:$0xff] %v3216_v53  ;;  %5065 = vst [vmem:[#allocation55_spill] sm:$0xff] %v3218_v3  ;;  %v5070_v3 = vmov 3  }
 0x1ab   : > { %1642 = vrot.lane.b32.xlu1 %v2948_v4, %s2607_s23  ;;  %1654 = vrot.lane.b32.xlu0 %v2857_v43, %s2607_s23 }
 0x1ac   : > { %v3224_v49 = vpop.permute.xlu1 %627  ;;  %v3226_v19 = vpop.permute.xlu0 %1046  ;;  %2448 = vset.pattern.permute.xlu1 %v5051_v12 }
 0x1ad   : > { %5066 = vst [vmem:[#allocation56_spill] sm:$0xff] %v3224_v49  ;;  %5067 = vst [vmem:[#allocation57_spill] sm:$0xff] %v3226_v19 }
 0x1af   : > { %1644 = vrot.lane.b32.xlu1 %v2964_v9, %s2607_s23  ;;  %1785 = vperm.xlu0 %2447, %v1775_v29  }
 0x1b0   : > { %v3234_v13 = vpop.permute.xlu1 %774  ;;  %v3236_v4 = vpop.permute.xlu0 %1247 }
 0x1b1   : > { %5068 = vst [vmem:[#allocation58_spill] sm:$0xff] %v3234_v13  ;;  %5069 = vst [vmem:[#allocation59_spill] sm:$0xff] %v3236_v4 }
 0x1b3   : > { %1660 = vrot.lane.b32.xlu1 %v2995_v28, %s2607_s23  ;;  %2450 = vset.pattern.permute.xlu0 %v5070_v3 }
 0x1b4   : > { %v3241_v19 = vpop.permute.xlu1 %1048  ;;  %1100 = vperm.xlu0 %2450, %v2782_v18   ;;  %v3244_v53 = vpop.permute.xlu0 %895 }
 0x1b5   : > { %5071 = vst [vmem:[#allocation60_spill] sm:$0xff] %v3241_v19  ;;  %5072 = vst [vmem:[#allocation61_spill] sm:$0xff] %v3244_v53  ;;  %v5078_v53 = vmov 4  }
 0x1b7   : > { %1503 = vrot.lane.b32.xlu1 %v2874_v50, %s2606_s21 }
 0x1b8   : > { %v3248_v49 = vpop.permute.xlu1 %1249  ;;  %1112 = vperm.xlu0 %2450, %v2762_v14   ;;  %v3251_v29 = vpop.permute.xlu0 %911 }
 0x1b9   : > { %5073 = vst [vmem:[#allocation62_spill] sm:$0xff] %v3248_v49  ;;  %5074 = vst [vmem:[#allocation63_spill] sm:$0xff] %v3251_v29  ;;  %v1777_v29 = vld [vmem:[%s4849_s5 + $0x10] sm:$0xff] }
 0x1bb   : > { %1519 = vrot.lane.b32.xlu1 %v2911_v59, %s2606_s21 }
 0x1bc   : > { %v3255_v4 = vpop.permute.xlu1 %897  ;;  %1124 = vperm.xlu0 %2450, %v2811_v24   ;;  %v3258_v19 = vpop.permute.xlu0 %613 }
 0x1bd   : > { %5075 = vst [vmem:[#allocation64_spill] sm:$0xff] %v3255_v4  ;;  %5076 = vst [vmem:[#allocation65_spill] sm:$0xff] %v3258_v19 }
 0x1bf   : > { %1716 = vperm.xlu1 %2448, %v2750_v11  }
 0x1c0   : > { %v3261_v18 = vpop.permute.xlu1 %913  ;;  %2451 = vset.pattern.permute.xlu0 %v5078_v53  ;;  %v3264_v49 = vpop.permute.xlu0 %760 }
 0x1c1   : > { %5077 = vst [vmem:[#allocation66_spill] sm:$0xff] %v3261_v18  ;;  %5079 = vst [vmem:[#allocation67_spill] sm:$0xff] %v3264_v49  ;;  %1172 = vperm.xlu0 %2451, %v2798_v21  }
 0x1c3   : > { %2449 = vset.pattern.permute.xlu1 %v5054_v30 }
 0x1c4   : > { %1795 = vperm.xlu1 %2449, %v1777_v29   ;;  %v3271_v4 = vpop.permute.xlu1 %615  ;;  %v3273_v19 = vpop.permute.xlu0 %1034 }
 0x1c5   : > { %5080 = vst [vmem:[#allocation68_spill] sm:$0xff] %v3271_v4  ;;  %5081 = vst [vmem:[#allocation69_spill] sm:$0xff] %v3273_v19  ;;  %1192 = vperm.xlu0 %2451, %v2787_v20  }
 0x1c8   : > { %1638 = vrot.lane.b32.xlu1 %v2843_v37, %s2607_s23  ;;  %v3278_v18 = vpop.permute.xlu0 %629  ;;  %v3280_v49 = vpop.permute.xlu1 %762 }
 0x1c9   : > { %5082 = vst [vmem:[#allocation70_spill] sm:$0xff] %v3278_v18  ;;  %5083 = vst [vmem:[#allocation71_spill] sm:$0xff] %v3280_v49  ;;  %2454 = vset.pattern.permute.xlu0 %v5039_v15  ;;  %v1776_v49 = vld [vmem:[%s4849_s5 + $0x8] sm:$0xff] }
 0x1ca   : > { %1313 = vperm.xlu0 %2454, %v2762_v14  }
 0x1cc   : > { %1640 = vrot.lane.b32.xlu1 %v2874_v50, %s2607_s23  ;;  %v3286_v29 = vpop.permute.xlu0 %776  ;;  %v3289_v19 = vpop.permute.xlu1 %1036 }
 0x1cd   : > { %5084 = vst [vmem:[#allocation72_spill] sm:$0xff] %v3286_v29  ;;  %5085 = vst [vmem:[#allocation73_spill] sm:$0xff] %v3289_v19 }
 0x1ce   : > { %1305 = vperm.xlu0 %2454, %v2750_v11  }
 0x1d0   : > { %1656 = vrot.lane.b32.xlu1 %v2911_v59, %s2607_s23  ;;  %v3293_v4 = vpop.permute.xlu0 %1050  ;;  %v3301_v18 = vpop.permute.xlu1 %631 }
 0x1d1   : > { %5086 = vst [vmem:[#allocation74_spill] sm:$0xff] %v3293_v4  ;;  %5088 = vst [vmem:[#allocation76_spill] sm:$0xff] %v3301_v18 }
 0x1d2   : > { %1329 = vperm.xlu0 %2454, %v2787_v20  }
 0x1d4   : > { %1790 = vperm.xlu1 %2449, %v1776_v49   ;;  %v3299_v14 = vpop.permute.xlu0 %899  ;;  %v3311_v4 = vpop.permute.xlu1 %778 }
 0x1d5   : > { %5087 = vst [vmem:[#allocation75_spill] sm:$0xff] %v3299_v14  ;;  %5090 = vst [vmem:[#allocation78_spill] sm:$0xff] %v3311_v4 }
 0x1d6   : > { %1239 = vrot.lane.b32.xlu0 %v2851_v41, %s2603_s20 }
 0x1d8   : > { %2452 = vset.pattern.permute.xlu1 %v5070_v3  ;;  %v3306_v19 = vpop.permute.xlu0 %915  ;;  %v3318_v14 = vpop.permute.xlu1 %1052 }
 0x1d9   : > { %5089 = vst [vmem:[#allocation77_spill] sm:$0xff] %v3306_v19  ;;  %1128 = vperm.xlu1 %2452, %v2787_v20   ;;  %5092 = vst [vmem:[#allocation80_spill] sm:$0xff] %v3318_v14 }
 0x1da   : > { %1255 = vrot.lane.b32.xlu0 %v2866_v47, %s2603_s20 }
 0x1dc   : > { %v3316_v49 = vpop.permute.xlu0 %1384 }
 0x1dd   : > { %2453 = vset.pattern.permute.xlu1 %v5078_v53  ;;  %5091 = vst [vmem:[#allocation79_spill] sm:$0xff] %v3316_v49 }
 0x1de   : > { %1188 = vperm.xlu1 %2453, %v2811_v24   ;;  %1321 = vperm.xlu0 %2454, %v2773_v16  }
 0x1e0   : > { %v3324_v19 = vpop.permute.xlu0 %1229 }
 0x1e1   : > { %5093 = vst [vmem:[#allocation81_spill] sm:$0xff] %v3324_v19 }
 0x1e2   : > { %2455 = vset.pattern.permute.xlu1 %v5070_v3  ;;  %2460 = vset.pattern.permute.xlu0 %v5044_v39 }
 0x1e3   : > { %1120 = vperm.xlu1 %2455, %v2773_v16   ;;  %1446 = vperm.xlu0 %2460, %v2798_v21  }
 0x1e4   : > { %v3333_v14 = vpop.permute.xlu0 %1245 }
 0x1e5   : > { %v3326_v4 = vpop.permute.xlu1 %1450  ;;  %5096 = vst [vmem:[#allocation84_spill] sm:$0xff] %v3333_v14 }
 0x1e6   : > { %5094 = vst [vmem:[#allocation82_spill] sm:$0xff] %v3326_v4 }
 0x1e7   : > { %2456 = vset.pattern.permute.xlu1 %v5039_v15  ;;  %1442 = vperm.xlu0 %2460, %v2750_v11  }
 0x1e8   : > { %1325 = vperm.xlu1 %2456, %v2811_v24   ;;  %v3342_v19 = vpop.permute.xlu0 %1521 }
 0x1e9   : > { %5098 = vst [vmem:[#allocation86_spill] sm:$0xff] %v3342_v19  ;;  %v637_v19 = vlaneseq }
 0x1ea   : > { %v3331_v49 = vpop.permute.xlu1 %1301 }
 0x1eb   : > { %5095 = vst [vmem:[#allocation83_spill] sm:$0xff] %v3331_v49  ;;  %1462 = vperm.xlu0 %2460, %v2811_v24   ;;  %v3362_v4 = vand.u32 127, %v637_v19 }
 0x1ec   : > { %2457 = vset.pattern.permute.xlu1 %v5078_v53 }
 0x1ed   : > { %1180 = vperm.xlu1 %2457, %v2805_v22   ;;  %vm1396_vm1 = vcmp.lt.s32.totalorder %v3362_v4, 113  ;;  %vm1533_vm2 = vcmp.lt.s32.totalorder %v3362_v4, 112  ;;  %vm921_vm3 = vcmp.lt.s32.totalorder %v3362_v4, 15  ;;  %vm639_vm4 = vcmp.lt.s32.totalorder %v3362_v4, 17 }
 0x1ee   : > { %v3338_v3 = vpop.permute.xlu1 %1368  ;;  %vm784_vm5 = vcmp.lt.s32.totalorder %v3362_v4, 16  ;;  %vm1058_vm6 = vcmp.lt.s32.totalorder %v3362_v4, 1  ;;  %vm1259_vm7 = vcmp.lt.s32.totalorder %v3362_v4, 127  ;;  %vm1670_vm8 = vcmp.lt.s32.totalorder %v3362_v4, 111 }
 0x1ef   : > { %5097 = vst [vmem:[#allocation85_spill] sm:$0xff] %v3338_v3  ;;  %1392 = vrot.lane.b32.xlu0 %v2866_v47, %s2604_s22 }
 0x1f1   : > { %1184 = vperm.xlu1 %2457, %v2773_v16  }
 0x1f2   : > { %v3345_v18 = vpop.permute.xlu1 %1370 }
 0x1f3   : > { %5099 = vst [vmem:[#allocation87_spill] sm:$0xff] %v3345_v18  ;;  %1237 = vrot.lane.b32.xlu0 %v3044_v2, %s2603_s20 }
 0x1f5   : > { %1241 = vrot.lane.b32.xlu1 %v2880_v52, %s2603_s20  ;;  %v3351_v53 = vpop.permute.xlu0 %1720 }
 0x1f6   : > { %5100 = vst [vmem:[#allocation88_spill] sm:$0xff] %v3351_v53  ;;  %v3353_v14 = vpop.permute.xlu1 %1386  ;;  %2458 = vset.pattern.permute.xlu1 %v5044_v39  ;;  %v3385_v53 = vshrl.u32 %v637_v19, 7 }
 0x1f7   : > { %5101 = vst [vmem:[#allocation89_spill] sm:$0xff] %v3353_v14  ;;  %1253 = vrot.lane.b32.xlu0 %v3067_v42, %s2603_s20 }
 0x1f9   : > { %1257 = vrot.lane.b32.xlu1 %v2917_v61, %s2603_s20  ;;  %v1367_v3 = vpop.permute.xlu0 %1366 }
 0x1fa   : > { %v3360_v29 = vpop.permute.xlu1 %1587 }
 0x1fb   : > { %5102 = vst [vmem:[#allocation90_spill] sm:$0xff] %v3360_v29  ;;  %1458 = vperm.xlu0 %2460, %v2773_v16  }
 0x1fd   : > { %1466 = vperm.xlu1 %2458, %v2787_v20   ;;  %v1383_v18 = vpop.permute.xlu0 %1382 }
 0x1fe   : > { %v3369_v14 = vsel %vm1396_vm1, %v1367_v3, %v1383_v18  ;;  %v3373_v49 = vsel %vm1396_vm1, %v1383_v18, %v1367_v3  ;;  %v3375_v30 = vpop.permute.xlu1 %1227  ;;  %v591_v18 = vld [vmem:[%s4844_s0] sm:$0xff] }
 0x1ff   : > { %5103 = vst [vmem:[#allocation91_spill] sm:$0xff] %v3369_v14  ;;  %5104 = vst [vmem:[#allocation92_spill] sm:$0xff] %v3373_v49  ;;  %2463 = vset.pattern.permute.xlu0 %v5061_v6  ;;  %v3399_v19 = vunpack.c.h.bf16 %v591_v18  ;;  %v3405_v14 = vsub.s32 0, %v3385_v53 }
 0x200   : > { %5105 = vst [vmem:[#allocation93_spill] sm:$0xff] %v3375_v30  ;;  %1583 = vperm.xlu0 %2463, %v2798_v21  }
 0x201   : > { %2459 = vset.pattern.permute.xlu1 %v5039_v15  ;;  %v3380_v29 = vpop.permute.xlu0 %1658  ;;  %v3397_v15 = vunpack.c.l.bf16 %v591_v18  ;;  %5109 = vst [vmem:[#allocation97_spill] sm:$0xff] %v3405_v14 }
 0x202   : > { %5106 = vst [vmem:[#allocation94_spill] sm:$0xff] %v3380_v29  ;;  %1317 = vperm.xlu1 %2459, %v2805_v22   ;;  %v3383_v13 = vpop.permute.xlu1 %1243 }
 0x203   : > { %5107 = vst [vmem:[#allocation95_spill] sm:$0xff] %v3383_v13  ;;  %v3441_v29 = vrot.slane %v3397_v15, %v3405_v14 }
 0x204   : > { %1579 = vperm.xlu0 %2463, %v2750_v11   ;;  %v940_v11 = vsub.s32 2, %v3385_v53 }
 0x205   : > { %v1502_v3 = vpop.permute.xlu0 %1501 }
 0x206   : > { %1376 = vrot.lane.b32.xlu1 %v2851_v41, %s2604_s22  ;;  %v3393_v21 = vpop.permute.xlu1 %1438  ;;  %v3420_v30 = vrot.slane %v3397_v15, %v940_v11  ;;  %v3423_v13 = vrot.slane %v3399_v19, %v940_v11  ;;  %v803_v11 = vsub.s32 1, %v3385_v53 }
 0x207   : > { %5108 = vst [vmem:[#allocation96_spill] sm:$0xff] %v3393_v21  ;;  %2461 = vset.pattern.permute.xlu1 %v5061_v6 }
 0x208   : > { %1599 = vperm.xlu0 %2463, %v2811_v24  }
 0x209   : > { %v1518_v49 = vpop.permute.xlu0 %1517 }
 0x20a   : > { %v3409_v21 = vsel %vm1533_vm2, %v1502_v3, %v1518_v49  ;;  %v3413_v6 = vsel %vm1533_vm2, %v1518_v49, %v1502_v3  ;;  %1378 = vrot.lane.b32.xlu1 %v2880_v52, %s2604_s22  ;;  %v3417_v18 = vpop.permute.xlu1 %1505  ;;  %v922_v49 = vsel %vm921_vm3, %v3050_v34, %v3069_v51  ;;  %v930_v3 = vsel %vm921_vm3, %v3069_v51, %v3050_v34 }
 0x20b   : > { %5110 = vst [vmem:[#allocation98_spill] sm:$0xff] %v3417_v18  ;;  %v3445_v52 = vrot.slane %v3399_v19, %v3405_v14  ;;  %v3453_v34 = vmul.f32 %v3003_v32, %v2964_v9  ;;  %v928_v51 = vsel %vm921_vm3, %v3058_v7, %v3077_v25  ;;  %v1077_v14 = vsub.s32 3, %v3385_v53 }
 0x20c   : > { %1529 = vrot.lane.b32.xlu0 %v2866_v47, %s2606_s21  ;;  %v3471_v9 = vmul.f32 %v3026_v44, %v2857_v43  ;;  %v947_v47 = vmul.f32 %v3423_v13, %v922_v49  ;;  %v3493_v49 = vrot.slane %v3397_v15, %v803_v11 }
 0x20d   : > { %v3436_v18 = vpop.permute.xlu0 %1712  ;;  %5113 = vst [vmem:[#allocation101_spill] sm:$0xff] %v3453_v34  ;;  %v946_v34 = vmul.f32 %v3420_v30, %v930_v3 }
 0x20e   : > { %5111 = vst [vmem:[#allocation99_spill] sm:$0xff] %v3436_v18  ;;  %1394 = vrot.lane.b32.xlu1 %v2917_v61, %s2604_s22  ;;  %v3449_v41 = vpop.permute.xlu1 %1507  ;;  %v936_v18 = vsel %vm921_vm3, %v3077_v25, %v3058_v7  ;;  %v1278_v61 = vsub.s32 5, %v3385_v53  ;;  %v3479_v25 = vmul.f32 %v3041_v60, %v2874_v50  ;;  %v3483_v7 = vmul.f32 %v3041_v60, %v2911_v59 }
 0x20f   : > { %5112 = vst [vmem:[#allocation100_spill] sm:$0xff] %v3449_v41  ;;  %v3467_v41 = vmul.f32 %v3026_v44, %v2843_v37  ;;  %v3488_v37 = vmul.f32 %v3003_v32, %v2995_v28  ;;  %v958_v43 = vmul.f32 %v3420_v30, %v936_v18  ;;  %v959_v44 = vmul.f32 %v3423_v13, %v928_v51 }
 0x210   : > { %1374 = vrot.lane.b32.xlu0 %v3044_v2, %s2604_s22  ;;  %5114 = vst [vmem:[#allocation102_spill] sm:$0xff] %v3479_v25  ;;  %5115 = vst [vmem:[#allocation103_spill] sm:$0xff] %v3483_v7  ;;  %v3496_v50 = vrot.slane %v3399_v19, %v803_v11  ;;  %v3505_v28 = vrot.slane %v3397_v15, %v1077_v14  ;;  %v3508_v32 = vrot.slane %v3399_v19, %v1077_v14 }
 0x211   : > { %5116 = vst [vmem:[#allocation104_spill] sm:$0xff] %v3488_v37  ;;  %v3511_v18 = vrot.slane %v3397_v15, %v1278_v61  ;;  %v3514_v3 = vmul.f32 %v2919_v62, %v946_v34  ;;  %v793_v11 = vsel %vm784_vm5, %v3118_v46, %v3071_v26  ;;  %v3524_v51 = vrot.slane %v3399_v19, %v1278_v61  ;;  %v5128_v37 = vld [vmem:[#allocation9_spill] sm:$0xff] }
 0x212   : > { %1603 = vperm.xlu1 %2461, %v2787_v20   ;;  %v3499_v59 = vpop.permute.xlu1 %1523  ;;  %v3501_v60 = vpop.permute.xlu0 %682  ;;  %v3517_v20 = vmul.f32 %v2919_v62, %v947_v47  ;;  %v785_v14 = vsel %vm784_vm5, %v3071_v26, %v3118_v46  ;;  %v791_v47 = vsel %vm784_vm5, %v3079_v1, %v3127_v55  ;;  %v799_v62 = vsel %vm784_vm5, %v3127_v55, %v3079_v1 }
 0x213   : > { %5117 = vst [vmem:[#allocation105_spill] sm:$0xff] %v3499_v59  ;;  %5118 = vst [vmem:[#allocation106_spill] sm:$0xff] %v3511_v18  ;;  %v1415_v61 = vsub.s32 6, %v3385_v53  ;;  %v3542_v34 = vmul.f32 %v3039_v57, %v958_v43  ;;  %v3545_v7 = vmul.f32 %v3039_v57, %v959_v44  ;;  %v640_v26 = vsel %vm639_vm4, %v3052_v5, %v3102_v33 }
 0x214   : > { %5119 = vst [vmem:[#allocation107_spill] sm:$0xff] %v3524_v51  ;;  %1390 = vrot.lane.b32.xlu0 %v3067_v42, %s2604_s22  ;;  %v648_v46 = vsel %vm639_vm4, %v3102_v33, %v3052_v5  ;;  %v646_v57 = vsel %vm639_vm4, %v3060_v17, %v3110_v23  ;;  %v654_v43 = vsel %vm639_vm4, %v3110_v23, %v3060_v17 }
 0x215   : > { %v809_v44 = vmul.f32 %v3493_v49, %v793_v11  ;;  %v649_v33 = vsel %vm639_vm4, %v3132_v63, %v3085_v31  ;;  %v810_v5 = vmul.f32 %v3496_v50, %v785_v14  ;;  %v822_v25 = vmul.f32 %v3496_v50, %v791_v47 }
 0x216   : > { %1235 = vrot.lane.b32.xlu1 %v3022_v38, %s2603_s20  ;;  %v3557_v1 = vpop.permute.xlu1 %1724  ;;  %v3559_v55 = vpop.permute.xlu0 %692  ;;  %v641_v23 = vsel %vm639_vm4, %v3085_v31, %v3132_v63  ;;  %v1067_v17 = vsel %vm1058_vm6, %v3134_v8, %v3087_v36  ;;  %v3591_v11 = vrot.slane %v3399_v19, %v1415_v61  ;;  %v1552_v14 = vsub.s32 7, %v3385_v53 }
 0x217   : > { %5120 = vst [vmem:[#allocation108_spill] sm:$0xff] %v3557_v1  ;;  %5121 = vst [vmem:[#allocation109_spill] sm:$0xff] %v3559_v55  ;;  %2462 = vset.pattern.permute.xlu1 %v5044_v39  ;;  %v821_v55 = vmul.f32 %v3493_v49, %v799_v62  ;;  %v3588_v39 = vrot.slane %v3397_v15, %v1415_v61  ;;  %v666_v47 = vmul.f32 %v3441_v29, %v649_v33 }
 0x218   : > { %1595 = vperm.xlu0 %2463, %v2773_v16   ;;  %5122 = vst [vmem:[#allocation110_spill] sm:$0xff] %v3591_v11  ;;  %v3596_v62 = vmul.f32 %v3441_v29, %v648_v46  ;;  %v3599_v16 = vmul.f32 %v3445_v52, %v640_v26  ;;  %v3608_v61 = vmul.f32 %v3441_v29, %v654_v43 }
 0x219   : > { %v667_v53 = vmul.f32 %v3445_v52, %v641_v23  ;;  %v1059_v46 = vsel %vm1058_vm6, %v3087_v36, %v3134_v8  ;;  %v3616_v26 = vmul.f32 %v2970_v10, %v809_v44  ;;  %v3619_v33 = vmul.f32 %v3445_v52, %v646_v57 }
 0x21a   : > { %1251 = vrot.lane.b32.xlu1 %v3033_v48, %s2603_s20  ;;  %v3603_v63 = vpop.permute.xlu1 %1364  ;;  %v3605_v31 = vpop.permute.xlu0 %702  ;;  %v3622_v42 = vmul.f32 %v2970_v10, %v810_v5  ;;  %v3626_v43 = vmul.f32 %v2909_v58, %v821_v55  ;;  %v3629_v23 = vmul.f32 %v2909_v58, %v822_v25  ;;  %v647_v8 = vsel %vm639_vm4, %v3093_v54, %v3139_v56  ;;  %v592_v58 = vld [vmem:[%s4844_s0 + $0x8] sm:$0x11]  ;;  %v5126_v5 = vld [vmem:[#allocation38_spill] sm:$0xff] }
 0x21b   : > { %5123 = vst [vmem:[#allocation111_spill] sm:$0xff] %v3605_v31  ;;  %v3632_v31 = vmul.f32 %v3505_v28, %v1067_v17  ;;  %v655_v10 = vsel %vm639_vm4, %v3139_v56, %v3093_v54  ;;  %v3643_v36 = vrot.slane %v3397_v15, %v1552_v14  ;;  %v3646_v55 = vrot.slane %v3399_v19, %v1552_v14  ;;  %v5127_v17 = vld [vmem:[#allocation34_spill] sm:$0xff] }
 0x21c   : > { %2466 = vset.pattern.permute.xlu0 %v5051_v12  ;;  %v722_v25 = vmul.f32 %v2841_v35, %v666_v47  ;;  %v786_v57 = vsel %vm784_vm5, %v3100_v27, %v3147_v40  ;;  %v794_v54 = vsel %vm784_vm5, %v3147_v40, %v3100_v27  ;;  %v3667_v15 = vmul.f32 %v3508_v32, %v1059_v46 }
 0x21d   : > { %5124 = vst [vmem:[#allocation112_spill] sm:$0xff] %v3643_v36  ;;  %5125 = vst [vmem:[#allocation113_spill] sm:$0xff] %v3646_v55  ;;  %1736 = vperm.xlu0 %2466, %v2811_v24   ;;  %v723_v19 = vmul.f32 %v2841_v35, %v667_v53  ;;  %v1073_v44 = vsel %vm1058_vm6, %v3141_v0, %v3095_v45  ;;  %v792_v27 = vsel %vm784_vm5, %v5127_v17, %v5126_v5 }
 0x21e   : > { %1454 = vperm.xlu1 %2462, %v2805_v22   ;;  %v3662_v56 = vpop.permute.xlu1 %1380  ;;  %v3664_v24 = vpop.permute.xlu0 %712  ;;  %v800_v22 = vsel %vm784_vm5, %v5126_v5, %v5127_v17  ;;  %v678_v40 = vmul.f32 %v3441_v29, %v655_v10  ;;  %v679_v14 = vmul.f32 %v3445_v52, %v647_v8  ;;  %v595_v35 = vunpack.c.l.bf16 %v592_v58  ;;  %v5131_v5 = vld [vmem:[#allocation35_spill] sm:$0xff]  ;;  %v5132_v17 = vld [vmem:[#allocation40_spill] sm:$0xff] }
 0x21f   : > { %v596_v47 = vunpack.c.h.bf16 %v592_v58  ;;  %v811_v53 = vmul.f32 %v3493_v49, %v794_v54  ;;  %v812_v46 = vmul.f32 %v3496_v50, %v786_v57  ;;  %v1558_v1 = vmul.f32 %v3643_v36, %v3409_v21  ;;  %v5129_v57 = vld [vmem:[#allocation7_spill] sm:$0xff] }
 0x220   : > { %v1559_v2 = vmul.f32 %v3646_v55, %v3413_v6  ;;  %v1065_v8 = vsel %vm1058_vm6, %v3095_v45, %v3141_v0  ;;  %v823_v10 = vmul.f32 %v3493_v49, %v800_v22  ;;  %v824_v58 = vmul.f32 %v3496_v50, %v792_v27  ;;  %v5133_v0 = vld [vmem:[#allocation41_spill] sm:$0xff] }
 0x221   : > { %1666 = vrot.lane.b32.xlu0 %v5128_v37, %s2607_s23  ;;  %v3704_v6 = vmul.f32 %v3505_v28, %v1073_v44  ;;  %v1068_v45 = vsel %vm1058_vm6, %v5132_v17, %v5131_v5  ;;  %v5134_v22 = vld [vmem:[#allocation37_spill] sm:$0xff] }
 0x222   : > { %1513 = vrot.lane.b32.xlu1 %v5129_v57, %s2606_s21  ;;  %v1576_v21 = vpop.permute.xlu1 %1575  ;;  %v3701_v54 = vpop.permute.xlu0 %1800  ;;  %v923_v27 = vsel %vm921_vm3, %v5134_v22, %v5133_v0  ;;  %v931_v44 = vsel %vm921_vm3, %v5133_v0, %v5134_v22  ;;  %v5140_v57 = vld [vmem:[#allocation10_spill] sm:$0xff]  ;;  %v5142_v0 = vld [vmem:[#allocation27_spill] sm:$0xff] }
 0x223   : > { %5130 = vst [vmem:[#allocation38_spill] sm:$0xff] %v3701_v54  ;;  %v3714_v37 = vmul.f32 %v1576_v21, %v1558_v1  ;;  %v3716_v55 = vmul.f32 %v1576_v21, %v1559_v2  ;;  %2464 = vset.pattern.permute.xlu1 %v5051_v12  ;;  %v5137_v54 = vld [vmem:[#allocation97_spill] sm:$0xff]  ;;  %v734_v1 = vmul.f32 %v5140_v57, %v678_v40  ;;  %v5141_v21 = vld [vmem:[#allocation12_spill] sm:$0xff] }
 0x224   : > { %v3725_v36 = vrot.slane %v595_v35, %v5137_v54  ;;  %v3728_v59 = vrot.slane %v596_v47, %v5137_v54  ;;  %v735_v2 = vmul.f32 %v5140_v57, %v679_v14  ;;  %v860_v12 = vmul.f32 %v5141_v21, %v812_v46  ;;  %v5143_v14 = vld [vmem:[#allocation11_spill] sm:$0xff] }
 0x225   : > { %5135 = vst [vmem:[#allocation34_spill] sm:$0xff] %v3714_v37  ;;  %5136 = vst [vmem:[#allocation35_spill] sm:$0xff] %v3716_v55  ;;  %v859_v55 = vmul.f32 %v5141_v21, %v811_v53  ;;  %1509 = vrot.lane.b32.xlu0 %v3022_v38, %s2606_s21  ;;  %v871_v22 = vmul.f32 %v5142_v0, %v823_v10  ;;  %v872_v37 = vmul.f32 %v5142_v0, %v824_v58  ;;  %v5144_v10 = vld [vmem:[#allocation94_spill] sm:$0xff] }
 0x226   : > { %5138 = vst [vmem:[#allocation40_spill] sm:$0xff] %v3725_v36  ;;  %5139 = vst [vmem:[#allocation41_spill] sm:$0xff] %v3728_v59  ;;  %v1060_v35 = vsel %vm1058_vm6, %v5131_v5, %v5132_v17  ;;  %v1085_v40 = vmul.f32 %v3505_v28, %v1068_v45  ;;  %1515 = vrot.lane.b32.xlu1 %v5143_v14, %s2606_s21  ;;  %v1643_v47 = vpop.permute.xlu1 %1642  ;;  %v3745_v53 = vpop.permute.xlu0 %1654  ;;  %v948_v46 = vmul.f32 %v3420_v30, %v931_v44 }
 0x227   : > { %v949_v57 = vmul.f32 %v3423_v13, %v923_v27  ;;  %v1673_v58 = vsel %vm1670_vm8, %v1643_v47, %v5144_v10  ;;  %v1681_v54 = vsel %vm1670_vm8, %v5144_v10, %v1643_v47  ;;  %v720_v5 = vmul.f32 %v3501_v60, %v3596_v62  ;;  %v5145_v62 = vld [vmem:[#allocation88_spill] sm:$0xff] }
 0x228   : > { %v721_v17 = vmul.f32 %v3501_v60, %v3599_v16  ;;  %v1699_v45 = vmul.f32 %v3725_v36, %v1673_v58  ;;  %v1700_v44 = vmul.f32 %v3728_v59, %v1681_v54  ;;  %v3761_v21 = vadd.f32 %v859_v55, %v722_v25  ;;  %v5148_v16 = vld [vmem:[#allocation15_spill] sm:$0xff] }
 0x229   : > { %v3763_v27 = vadd.f32 %v860_v12, %v723_v19  ;;  %v3766_v0 = vmul.f32 %v3508_v32, %v1060_v35  ;;  %1525 = vrot.lane.b32.xlu0 %v3033_v48, %s2606_s21  ;;  %v3771_v47 = vmul.f32 %v3508_v32, %v1065_v8  ;;  %v3783_v25 = vadd.f32 %v871_v22, %v734_v1  ;;  %v5152_v35 = vld [vmem:[#allocation22_spill] sm:$0xff]  ;;  %v5153_v8 = vld [vmem:[#allocation28_spill] sm:$0xff] }
 0x22a   : > { %v3774_v10 = vmul.f32 %v5145_v62, %v1699_v45  ;;  %v3777_v60 = vmul.f32 %v5145_v62, %v1700_v44  ;;  %1531 = vrot.lane.b32.xlu1 %v5148_v16, %s2606_s21  ;;  %v1645_v12 = vpop.permute.xlu1 %1644  ;;  %v3781_v55 = vpop.permute.xlu0 %1785  ;;  %v3785_v19 = vadd.f32 %v872_v37, %v735_v2  ;;  %v3788_v58 = vmul.f32 %v5152_v35, %v1085_v40  ;;  %v5154_v45 = vld [vmem:[#allocation95_spill] sm:$0xff]  ;;  %v5156_v37 = vld [vmem:[#allocation42_spill] sm:$0xff]  ;;  %v5157_v2 = vld [vmem:[#allocation36_spill] sm:$0xff] }
 0x22b   : > { %5149 = vst [vmem:[#allocation10_spill] sm:$0xff] %v3781_v55  ;;  %5150 = vst [vmem:[#allocation12_spill] sm:$0xff] %v3783_v25  ;;  %v3791_v54 = vmul.f32 %v5153_v8, %v948_v46  ;;  %v3802_v1 = vmul.f32 %v5153_v8, %v949_v57  ;;  %v3808_v22 = vsel %vm1058_vm6, %v5157_v2, %v5156_v37  ;;  %v5160_v8 = vld [vmem:[#allocation56_spill] sm:$0xff] }
 0x22c   : > { %5146 = vst [vmem:[#allocation37_spill] sm:$0xff] %v3774_v10  ;;  %5147 = vst [vmem:[#allocation97_spill] sm:$0xff] %v3777_v60  ;;  %v5155_v10 = vld [vmem:[#allocation93_spill] sm:$0xff]  ;;  %v873_v40 = vadd.f32 %v3616_v26, %v720_v5  ;;  %v874_v46 = vadd.f32 %v3622_v42, %v721_v17  ;;  %v3816_v60 = vsel %vm1058_vm6, %v5156_v37, %v5157_v2  ;;  %v3835_v26 = vld [vmem:[%s4848_s4 + $0x20] sm:$0xff] }
 0x22d   : > { %5151 = vst [vmem:[#allocation27_spill] sm:$0xff] %v3785_v19  ;;  %v1260_v44 = vsel %vm1259_vm7, %v5155_v10, %v5154_v45  ;;  %v1268_v62 = vsel %vm1259_vm7, %v5154_v45, %v5155_v10  ;;  %v5158_v10 = vld [vmem:[#allocation43_spill] sm:$0xff]  ;;  %v5161_v19 = vld [vmem:[#allocation48_spill] sm:$0xff]  ;;  %1728 = vperm.xlu0 %2466, %v3835_v26   ;;  %v5162_v5 = vld [vmem:[#allocation58_spill] sm:$0xff]  ;;  %v1397_v59 = vsel %vm1396_vm1, %v3603_v63, %v3662_v56 }
 0x22e   : > { %v5159_v45 = vld [vmem:[#allocation39_spill] sm:$0xff]  ;;  %v643_v25 = vsel %vm639_vm4, %v5161_v19, %v5160_v8  ;;  %v651_v42 = vsel %vm639_vm4, %v5160_v8, %v5161_v19  ;;  %v5163_v17 = vld [vmem:[#allocation50_spill] sm:$0xff]  ;;  %v1284_v55 = vmul.f32 %v3511_v18, %v1260_v44  ;;  %v1285_v19 = vmul.f32 %v3524_v51, %v1268_v62  ;;  %v2511_v8 = vld [vmem:[%s4848_s4 + $0x38] sm:$0xff]  ;;  %v1661_v16 = vpop.permute.xlu1 %1660 }
 0x22f   : > { %v3822_v57 = vsel %vm921_vm3, %v5159_v45, %v5158_v10  ;;  %v788_v37 = vsel %vm784_vm5, %v5163_v17, %v5162_v5  ;;  %v796_v2 = vsel %vm784_vm5, %v5162_v5, %v5163_v17  ;;  %1740 = vperm.xlu1 %2464, %v2511_v8   ;;  %v1405_v5 = vsel %vm1396_vm1, %v3662_v56, %v3603_v63  ;;  %v1101_v17 = vpop.permute.xlu0 %1100  ;;  %v1782_v63 = vld [vmem:[%s4849_s5 + $0x38] sm:$0xff] }
 0x230   : > { %v3861_v44 = vsel %vm1670_vm8, %v1645_v12, %v1661_v16  ;;  %v3865_v62 = vsel %vm1670_vm8, %v1661_v16, %v1645_v12  ;;  %v1010_v8 = vadd.f32 %v3514_v3, %v873_v40  ;;  %v1011_v36 = vadd.f32 %v3517_v20, %v874_v46 }
 0x231   : > { %v1131_v51 = vmul.f32 %v1101_v17, %v3632_v31  ;;  %v1132_v18 = vmul.f32 %v1101_v17, %v3667_v15  ;;  %v3878_v56 = vsel %vm921_vm3, %v5158_v10, %v5159_v45  ;;  %v670_v16 = vmul.f32 %v3441_v29, %v651_v42  ;;  %v5166_v17 = vld [vmem:[#allocation83_spill] sm:$0xff] }
 0x232   : > { %v732_v3 = vmul.f32 %v3664_v24, %v3608_v61  ;;  %v733_v20 = vmul.f32 %v3664_v24, %v3619_v33  ;;  %v5164_v31 = vmov 0   ;;  %v1421_v15 = vmul.f32 %v3588_v39, %v1397_v59  ;;  %v1504_v10 = vpop.permute.xlu1 %1503 }
 0x233   : > { %2469 = vset.pattern.permute.xlu0 %v5164_v31  ;;  %v1422_v12 = vmul.f32 %v3591_v11, %v1405_v5  ;;  %v1147_v40 = vadd.f32 %v1131_v51, %v1010_v8  ;;  %v1148_v46 = vadd.f32 %v1132_v18, %v1011_v36  ;;  %1372 = vrot.lane.b32.xlu1 %v3022_v38, %s2604_s22  ;;  %v1113_v33 = vpop.permute.xlu0 %1112  ;;  %v5165_v24 = vmov 7   ;;  %v5167_v36 = vld [vmem:[#allocation63_spill] sm:$0xff]  ;;  %v5168_v8 = vld [vmem:[#allocation61_spill] sm:$0xff] }
 0x234   : > { %v671_v45 = vmul.f32 %v3445_v52, %v643_v25  ;;  %v815_v42 = vmul.f32 %v3493_v49, %v796_v2  ;;  %v816_v61 = vmul.f32 %v3496_v50, %v788_v37  ;;  %1820 = vperm.xlu0 %2469, %v1782_v63   ;;  %2465 = vset.pattern.permute.xlu1 %v5165_v24  ;;  %v5169_v63 = vld [vmem:[#allocation96_spill] sm:$0xff] }
 0x235   : > { %v1332_v59 = vmul.f32 %v5166_v17, %v1284_v55  ;;  %v1333_v5 = vmul.f32 %v5166_v17, %v1285_v19  ;;  %v1211_v18 = vadd.f32 %v3467_v41, %v1147_v40  ;;  %v1212_v51 = vadd.f32 %v3471_v9, %v1148_v46  ;;  %v5170_v24 = vld [vmem:[#allocation60_spill] sm:$0xff] }
 0x236   : > { %v925_v25 = vsel %vm921_vm3, %v5168_v8, %v5167_v36  ;;  %v933_v37 = vsel %vm921_vm3, %v5167_v36, %v5168_v8  ;;  %v885_v2 = vadd.f32 %v3626_v43, %v732_v3  ;;  %v886_v55 = vadd.f32 %v3629_v23, %v733_v20  ;;  %v1520_v46 = vpop.permute.xlu1 %1519  ;;  %v5171_v17 = vld [vmem:[#allocation52_spill] sm:$0xff] }
 0x237   : > { %v1469_v19 = vmul.f32 %v5169_v63, %v1421_v15  ;;  %v1470_v41 = vmul.f32 %v5169_v63, %v1422_v12  ;;  %v1348_v40 = vadd.f32 %v1332_v59, %v1211_v18  ;;  %v1349_v9 = vadd.f32 %v1333_v5, %v1212_v51  ;;  %1388 = vrot.lane.b32.xlu1 %v3033_v48, %s2604_s22  ;;  %v1125_v20 = vpop.permute.xlu0 %1124  ;;  %v1779_v18 = vld [vmem:[%s4849_s5 + $0x20] sm:$0xff]  ;;  %v5174_v63 = vld [vmem:[#allocation23_spill] sm:$0xff]  ;;  %s4798_s22 = scalar_lea.sflag [#allocation4], %s383_s12 }
 0x238   : > { %v1062_v38 = vsel %vm1058_vm6, %v5171_v17, %v5170_v24  ;;  %v1070_v43 = vsel %vm1058_vm6, %v5170_v24, %v5171_v17  ;;  %v3922_v23 = vsel %vm1533_vm2, %v1504_v10, %v1520_v46  ;;  %v3926_v3 = vsel %vm1533_vm2, %v1520_v46, %v1504_v10  ;;  %1662 = vrot.lane.b32.xlu0 %v3033_v48, %s2607_s23 }
 0x239   : > { %5172 = vst [vmem:[#allocation11_spill] sm:$0xff] %v3922_v23  ;;  %5173 = vst [vmem:[#allocation94_spill] sm:$0xff] %v3926_v3  ;;  %v952_v15 = vmul.f32 %v3420_v30, %v933_v37  ;;  %v953_v12 = vmul.f32 %v3423_v13, %v925_v25  ;;  %v1485_v59 = vadd.f32 %v1469_v19, %v1348_v40  ;;  %v5175_v19 = vld [vmem:[#allocation34_spill] sm:$0xff]  ;;  %v5176_v40 = vld [vmem:[#allocation35_spill] sm:$0xff] }
 0x23a   : > { %v1486_v5 = vadd.f32 %v1470_v41, %v1349_v9  ;;  %v1022_v51 = vadd.f32 %v3542_v34, %v885_v2  ;;  %v1023_v36 = vadd.f32 %v3545_v7, %v886_v55  ;;  %v1143_v10 = vmul.f32 %v1125_v20, %v3704_v6  ;;  %v3942_v25 = vpop.permute.xlu1 %1716  ;;  %v5177_v34 = vld [vmem:[#allocation6_spill] sm:$0xff] }
 0x23b   : > { %v1144_v8 = vmul.f32 %v1125_v20, %v3771_v47  ;;  %v863_v46 = vmul.f32 %v5174_v63, %v815_v42  ;;  %v864_v37 = vmul.f32 %v5174_v63, %v816_v61  ;;  %1591 = vperm.xlu1 %2465, %v3835_v26   ;;  %v3945_v41 = vadd.f32 %v5175_v19, %v1485_v59  ;;  %v5178_v42 = vld [vmem:[#allocation17_spill] sm:$0xff]  ;;  %v5186_v63 = vld [vmem:[#allocation62_spill] sm:$0xff] }
 0x23c   : > { %v3948_v9 = vadd.f32 %v5176_v40, %v1486_v5  ;;  %v726_v7 = vmul.f32 %v5177_v34, %v670_v16  ;;  %v727_v6 = vmul.f32 %v5177_v34, %v671_v45  ;;  %v3952_v2 = vadd.f32 %v1143_v10, %v1022_v51  ;;  %1805 = vperm.xlu0 %2469, %v1779_v18   ;;  %v3960_v17 = vpop.permute.xlu0 %1172  ;;  %v2101_v16 = vld [vmem:[%s4851_s7] sm:$0xff]  ;;  %v5180_v18 = vld [vmem:[#allocation7_spill] sm:$0xff]  ;;  %v5188_v40 = vld [vmem:[#allocation105_spill] sm:$0xff] }
 0x23d   : > { %v3954_v47 = vadd.f32 %v1144_v8, %v1023_v36  ;;  %v1000_v61 = vmul.f32 %v5178_v42, %v952_v15  ;;  %v1001_v26 = vmul.f32 %v5178_v42, %v953_v12  ;;  %v1089_v55 = vmul.f32 %v3505_v28, %v1070_v43  ;;  %5179 = vst [vmem:[#allocation88_spill] sm:$0xff] %v3960_v17  ;;  %v5189_v34 = vld [vmem:[#allocation100_spill] sm:$0xff]  ;;  %v5251_v17 = vld [vmem:[#allocation77_spill] sm:$0xff] }
 0x23e   : > { %v1090_v24 = vmul.f32 %v3508_v32, %v1062_v38  ;;  %v1134_v45 = vmul.f32 %v5152_v35, %v3766_v0  ;;  %v1012_v20 = vadd.f32 %v3791_v54, %v3761_v21  ;;  %v960_v15 = vmul.f32 %v3420_v30, %v3878_v56  ;;  %v5184_v56 = vld [vmem:[#allocation87_spill] sm:$0xff] }
 0x23f   : > { %v961_v43 = vmul.f32 %v3423_v13, %v3822_v57  ;;  %v879_v12 = vadd.f32 %v863_v46, %v726_v7  ;;  %v880_v38 = vadd.f32 %v864_v37, %v727_v6  ;;  %v1137_v59 = vmul.f32 %v1113_v33, %v1089_v55  ;;  %1650 = vrot.lane.b32.xlu1 %v5180_v18, %s2607_s23  ;;  %v3977_v0 = vpop.permute.xlu1 %1795  ;;  %v5183_v57 = vld [vmem:[#allocation89_spill] sm:$0xff]  ;;  %v5187_v46 = vld [vmem:[#allocation54_spill] sm:$0xff] }
 0x240   : > { %v1138_v5 = vmul.f32 %v1113_v33, %v1090_v24  ;;  %v1013_v51 = vadd.f32 %v3802_v1, %v3763_v27  ;;  %5181 = vst [vmem:[#allocation22_spill] sm:$0xff] %v3977_v0  ;;  %v5182_v35 = vmov 8   ;;  %v3982_v21 = vmul.f32 %v3505_v28, %v3816_v60  ;;  %2105 = vperm.xlu0 %2469, %v2101_v16   ;;  %v3996_v10 = vpop.permute.xlu0 %1192  ;;  %v5185_v60 = vld [vmem:[#allocation21_spill] sm:$0xff] }
 0x241   : > { %2467 = vset.pattern.permute.xlu1 %v5182_v35  ;;  %v3986_v54 = vmul.f32 %v3508_v32, %v3808_v22  ;;  %v1400_v33 = vsel %vm1396_vm1, %v5184_v56, %v5183_v57  ;;  %v1408_v27 = vsel %vm1396_vm1, %v5183_v57, %v5184_v56  ;;  %v1016_v1 = vadd.f32 %v1000_v61, %v879_v12  ;;  %v5193_v57 = vld [vmem:[#allocation112_spill] sm:$0xff] }
 0x242   : > { %v1017_v36 = vadd.f32 %v1001_v26, %v880_v38  ;;  %v3999_v8 = vmul.f32 %v5185_v60, %v960_v15  ;;  %v4002_v22 = vmul.f32 %v5185_v60, %v961_v43  ;;  %v1263_v37 = vsel %vm1259_vm7, %v5187_v46, %v5186_v63  ;;  %v5191_v38 = vld [vmem:[#allocation106_spill] sm:$0xff] }
 0x243   : > { %v1271_v19 = vsel %vm1259_vm7, %v5186_v63, %v5187_v46  ;;  %v1537_v7 = vsel %vm1533_vm2, %v5189_v34, %v5188_v40  ;;  %v1545_v6 = vsel %vm1533_vm2, %v5188_v40, %v5189_v34  ;;  %v1153_v42 = vadd.f32 %v1137_v59, %v1016_v1  ;;  %1652 = vrot.lane.b32.xlu1 %v5143_v14, %s2607_s23  ;;  %v1639_v24 = vpop.permute.xlu1 %1638  ;;  %v5198_v63 = vld [vmem:[#allocation104_spill] sm:$0xff] }
 0x244   : > { %v1154_v61 = vadd.f32 %v1138_v5, %v1017_v36  ;;  %v1427_v26 = vmul.f32 %v3588_v39, %v1400_v33  ;;  %v1428_v55 = vmul.f32 %v3591_v11, %v1408_v27  ;;  %v4025_v16 = vadd.f32 %v3788_v58, %v1012_v20  ;;  %v5192_v5 = vld [vmem:[#allocation107_spill] sm:$0xff]  ;;  %v5194_v33 = vld [vmem:[#allocation113_spill] sm:$0xff]  ;;  %v5195_v58 = vld [vmem:[#allocation40_spill] sm:$0xff] }
 0x245   : > { %v4027_v15 = vadd.f32 %v1134_v45, %v1013_v51  ;;  %v1671_v43 = vsel %vm1670_vm8, %v1639_v24, %v3745_v53  ;;  %v1679_v12 = vsel %vm1670_vm8, %v3745_v53, %v1639_v24  ;;  %v1290_v59 = vmul.f32 %v5191_v38, %v1263_v37  ;;  %v5196_v45 = vld [vmem:[#allocation41_spill] sm:$0xff]  ;;  %v1314_v1 = vpop.permute.xlu0 %1313  ;;  %v5199_v53 = vld [vmem:[#allocation15_spill] sm:$0xff]  ;;  %v5200_v37 = vld [vmem:[#allocation82_spill] sm:$0xff] }
 0x246   : > { %v1291_v35 = vmul.f32 %v5192_v5, %v1271_v19  ;;  %v1564_v56 = vmul.f32 %v5193_v57, %v1537_v7  ;;  %v1565_v27 = vmul.f32 %v5194_v33, %v1545_v6  ;;  %v1695_v20 = vmul.f32 %v5195_v58, %v1671_v43  ;;  %v5197_v36 = vld [vmem:[#allocation101_spill] sm:$0xff]  ;;  %v5201_v24 = vld [vmem:[#allocation99_spill] sm:$0xff] }
 0x247   : > { %5190 = vst [vmem:[#allocation28_spill] sm:$0xff] %v4027_v15  ;;  %v1696_v51 = vmul.f32 %v5196_v45, %v1679_v12  ;;  %v1217_v60 = vadd.f32 %v5197_v36, %v1153_v42  ;;  %v1218_v46 = vadd.f32 %v5198_v63, %v1154_v61  ;;  %v1338_v40 = vmul.f32 %v1314_v1, %v1290_v59  ;;  %v1641_v0 = vpop.permute.xlu1 %1640  ;;  %v5204_v36 = vld [vmem:[#allocation90_spill] sm:$0xff] }
 0x248   : > { %v1339_v34 = vmul.f32 %v1314_v1, %v1291_v35  ;;  %1668 = vrot.lane.b32.xlu1 %v5199_v53, %s2607_s23  ;;  %v1475_v19 = vmul.f32 %v5200_v37, %v1427_v26  ;;  %v1476_v7 = vmul.f32 %v5200_v37, %v1428_v55  ;;  %v1743_v6 = vmul.f32 %v5201_v24, %v1695_v20  ;;  %v5202_v35 = vld [vmem:[#allocation46_spill] sm:$0xff]  ;;  %v5203_v1 = vld [vmem:[#allocation44_spill] sm:$0xff]  ;;  %v5207_v37 = vld [vmem:[#allocation47_spill] sm:$0xff] }
 0x249   : > { %v1744_v43 = vmul.f32 %v5201_v24, %v1696_v51  ;;  %v1701_v12 = vmul.f32 %v5195_v58, %v3861_v44  ;;  %v1702_v42 = vmul.f32 %v5196_v45, %v3865_v62  ;;  %v1354_v61 = vadd.f32 %v1338_v40, %v1217_v60  ;;  %v4063_v44 = vpop.permute.xlu0 %1305  ;;  %v5205_v40 = vld [vmem:[#allocation32_spill] sm:$0xff] }
 0x24a   : > { %v1355_v59 = vadd.f32 %v1339_v34, %v1218_v46  ;;  %v924_v26 = vsel %vm921_vm3, %v5203_v1, %v5202_v35  ;;  %v932_v55 = vsel %vm921_vm3, %v5202_v35, %v5203_v1  ;;  %v1759_v20 = vadd.f32 %v1743_v6, %v3945_v41  ;;  %v5206_v34 = vld [vmem:[#allocation55_spill] sm:$0xff]  ;;  %v5208_v6 = vld [vmem:[#allocation10_spill] sm:$0xff] }
 0x24b   : > { %v1760_v51 = vadd.f32 %v1744_v43, %v3948_v9  ;;  %v1612_v62 = vmul.f32 %v5204_v36, %v1564_v56  ;;  %v1613_v60 = vmul.f32 %v5204_v36, %v1565_v27  ;;  %v1491_v63 = vadd.f32 %v1475_v19, %v1354_v61  ;;  %v1657_v9 = vpop.permute.xlu1 %1656  ;;  %v5211_v19 = vld [vmem:[#allocation108_spill] sm:$0xff] }
 0x24c   : > { %v1492_v46 = vadd.f32 %v1476_v7, %v1355_v59  ;;  %1511 = vrot.lane.b32.xlu1 %v5205_v40, %s2606_s21  ;;  %v787_v24 = vsel %vm784_vm5, %v5207_v37, %v5206_v34  ;;  %v795_v41 = vsel %vm784_vm5, %v5206_v34, %v5207_v37  ;;  %v4081_v27 = vadd.f32 %v5208_v6, %v1759_v20 }
 0x24d   : > { %v4078_v56 = vadd.f32 %v5208_v6, %v1760_v51  ;;  %v1749_v7 = vmul.f32 %v5211_v19, %v1701_v12  ;;  %v1750_v43 = vmul.f32 %v5211_v19, %v1702_v42  ;;  %v1628_v61 = vadd.f32 %v1612_v62, %v1491_v63  ;;  %v4091_v34 = vpop.permute.xlu0 %1329  ;;  %v5213_v62 = vld [vmem:[#allocation33_spill] sm:$0xff] }
 0x24e   : > { %5210 = vst [vmem:[#allocation93_spill] sm:$0xff] %v4081_v27  ;;  %v1629_v59 = vadd.f32 %v1613_v60, %v1492_v46  ;;  %v950_v35 = vmul.f32 %v3420_v30, %v932_v55  ;;  %v951_v1 = vmul.f32 %v3423_v13, %v924_v26  ;;  %v1672_v36 = vsel %vm1670_vm8, %v1641_v0, %v1657_v9  ;;  %v5214_v55 = vld [vmem:[#allocation53_spill] sm:$0xff] }
 0x24f   : > { %5209 = vst [vmem:[#allocation95_spill] sm:$0xff] %v4078_v56  ;;  %v1680_v51 = vsel %vm1670_vm8, %v1657_v9, %v1641_v0  ;;  %5212 = vst [vmem:[#allocation42_spill] sm:$0xff] %v4091_v34  ;;  %v1765_v20 = vadd.f32 %v1749_v7, %v1628_v61  ;;  %v1697_v12 = vmul.f32 %v5195_v58, %v1672_v36  ;;  %v5215_v60 = vld [vmem:[#allocation45_spill] sm:$0xff]  ;;  %v4107_v9 = vpop.permute.xlu1 %1790  ;;  %v5219_v7 = vld [vmem:[#allocation38_spill] sm:$0xff] }
 0x250   : > { %v1766_v37 = vadd.f32 %v1750_v43, %v1629_v59  ;;  %v1698_v42 = vmul.f32 %v5196_v45, %v1680_v51  ;;  %1527 = vrot.lane.b32.xlu1 %v5213_v62, %s2606_s21  ;;  %v642_v26 = vsel %vm639_vm4, %v5215_v60, %v5214_v55  ;;  %v650_v0 = vsel %vm639_vm4, %v5214_v55, %v5215_v60  ;;  %v5220_v59 = vld [vmem:[#allocation64_spill] sm:$0xff]  ;;  %v5221_v36 = vld [vmem:[#allocation66_spill] sm:$0xff]  ;;  %s2317_s21 = sshll.u32 %s383_s12, 5 }
 0x251   : > { %v813_v63 = vmul.f32 %v3493_v49, %v795_v41  ;;  %v814_v46 = vmul.f32 %v3496_v50, %v787_v24  ;;  %5216 = vst [vmem:[#allocation36_spill] sm:$0xff] %v4107_v9  ;;  %v4110_v6 = vmul.f32 %v3942_v25, %v1697_v12  ;;  %v4116_v43 = vadd.f32 %v5219_v7, %v1765_v20  ;;  %v5222_v24 = vld [vmem:[#allocation102_spill] sm:$0xff]  ;;  %v1240_v12 = vpop.permute.xlu0 %1239  ;;  %v5223_v55 = vld [vmem:[#allocation12_spill] sm:$0xff]  ;;  %s385_s14 = scalar_lea.vmem [#allocation3], %s2317_s21  ;;  %s2519_s21 = scalar_lea.vmem %s2518_s11, 1024 }
 0x252   : > { %v4113_v19 = vmul.f32 %v3942_v25, %v1698_v42  ;;  %v4119_v61 = vadd.f32 %v5219_v7, %v1766_v37  ;;  %v934_v41 = vsel %vm921_vm3, %v5221_v36, %v5220_v59  ;;  %v4127_v51 = vadd.f32 %v5222_v24, %v4025_v16  ;;  %v5224_v42 = vld [vmem:[#allocation27_spill] sm:$0xff]  ;;  %v5225_v60 = vld [vmem:[#allocation16_spill] sm:$0xff]  ;;  %v5227_v24 = vld [vmem:[#allocation49_spill] sm:$0xff]  ;;  %s2162_s19 = sshll.u32 %s385_s14, 4  ;;  %s4791_s19 = int_to_ptr.vmem [resolvable:$true] %s2162_s19 }
 0x253   : > { %5217 = vst [vmem:[#allocation43_spill] sm:$0xff] %v4110_v6  ;;  %v1024_v25 = vadd.f32 %v3999_v8, %v5223_v55  ;;  %v1025_v20 = vadd.f32 %v4002_v22, %v5224_v42  ;;  %v4134_v45 = vmul.f32 %v5225_v60, %v950_v35  ;;  %v4137_v37 = vmul.f32 %v5225_v60, %v951_v1  ;;  %v2512_v16 = vld [vmem:[%s4848_s4 + $0x28] sm:$0xff]  ;;  %v5226_v8 = vld [vmem:[#allocation57_spill] sm:$0xff]  ;;  %v1781_v9 = vld [vmem:[%s4849_s5 + $0x30] sm:$0xff]  ;;  %s2513_s20 = scalar_lea.vmem %s4791_s19, 512  ;;  %p2520_p1 = scmp.lt.s32.totalorder %s4791_s19, %s2518_s11 }
 0x254   : > { %5218 = vst [vmem:[#allocation39_spill] sm:$0xff] %v4113_v19  ;;  %v4140_v7 = vmul.f32 %v3441_v29, %v650_v0  ;;  %v4143_v58 = vmul.f32 %v3445_v52, %v642_v26  ;;  %1732 = vperm.xlu1 %2467, %v2512_v16   ;;  %v4152_v22 = vsel %vm1058_vm6, %v5227_v24, %v5226_v8  ;;  %v5228_v1 = vld [vmem:[#allocation13_spill] sm:$0xff]  ;;  %v5229_v42 = vld [vmem:[#allocation59_spill] sm:$0xff]  ;;  %v5234_v19 = vld [vmem:[#allocation72_spill] sm:$0xff]  ;;  %p2514_p12 = scmp.ne.s32.totalorder %s4791_s19, %s2513_s20  ;;  %p2521_p2 = scmp.lt.s32.totalorder %s2519_s21, %s2513_s20 }
 0x255   : > { %v926_v35 = vsel %vm921_vm3, %v5220_v59, %v5221_v36  ;;  %v4159_v0 = vmul.f32 %v5228_v1, %v813_v63  ;;  %v4162_v26 = vmul.f32 %v5228_v1, %v814_v46  ;;  %v4168_v55 = vsel %vm1058_vm6, %v5226_v8, %v5227_v24  ;;  %v5230_v60 = vld [vmem:[#allocation51_spill] sm:$0xff]  ;;  %v5231_v36 = vld [vmem:[#allocation70_spill] sm:$0xff]  ;;  %v5232_v63 = vld [vmem:[#allocation65_spill] sm:$0xff]  ;;  %v1129_v1 = vpop.permute.xlu1 %1128  ;;  %v1256_v23 = vpop.permute.xlu0 %1255 }
 0x256   : > { %v4174_v16 = vsel %vm1259_vm7, %v5230_v60, %v5229_v42  ;;  %v954_v59 = vmul.f32 %v3420_v30, %v934_v41  ;;  %v644_v46 = vsel %vm639_vm4, %v5232_v63, %v5231_v36  ;;  %v652_v8 = vsel %vm639_vm4, %v5231_v36, %v5232_v63  ;;  %v5233_v24 = vld [vmem:[#allocation67_spill] sm:$0xff]  ;;  %v5248_v34 = vld [vmem:[#allocation30_spill] sm:$0xff]  ;;  %p2515_p13 = pnand %p2514_p12, %p2695_p4  ;;  %p2522_p3 = por %p2521_p2, %p2520_p1 }
 0x257   : > { %v797_v41 = vsel %vm784_vm5, %v5234_v19, %v5233_v24  ;;  %v1145_v6 = vmul.f32 %v1129_v1, %v3982_v21  ;;  %v1146_v3 = vmul.f32 %v1129_v1, %v3986_v54  ;;  %v955_v27 = vmul.f32 %v3423_v13, %v926_v35 }
 0x258   : > { %v789_v56 = vsel %vm784_vm5, %v5233_v24, %v5234_v19  ;;  %v1266_v36 = vsel %vm1259_vm7, %v1240_v12, %v1256_v23  ;;  %v1274_v63 = vsel %vm1259_vm7, %v1256_v23, %v1240_v12  ;;  %2468 = vset.pattern.permute.xlu1 %v5164_v31  ;;  %v1209_v21 = vmul.f32 %v3996_v10, %v5143_v14  ;;  %v5235_v19 = vld [vmem:[#allocation68_spill] sm:$0xff]  ;;  %p2516_p0 = pneg %p2515_p13 }
 0x259   : > { %v1210_v54 = vmul.f32 %v3996_v10, %v5199_v53  ;;  %v1161_v35 = vadd.f32 %v1145_v6, %v1024_v25  ;;  %v1162_v1 = vadd.f32 %v1146_v3, %v1025_v20  ;;  %1815 = vperm.xlu1 %2468, %v1781_v9   ;;  %v817_v15 = vmul.f32 %v3493_v49, %v797_v41  ;;  %v5236_v24 = vld [vmem:[#allocation76_spill] sm:$0xff]  ;;  %v1189_v53 = vpop.permute.xlu1 %1188  ;;  %v4224_v9 = vpop.permute.xlu0 %1321  ;;  %v5240_v6 = vld [vmem:[#allocation71_spill] sm:$0xff]  ;;  %v5241_v25 = vld [vmem:[#allocation78_spill] sm:$0xff] }
 0x25a   : > { %v653_v33 = vsel %vm639_vm4, %v5236_v24, %v5235_v19  ;;  %v672_v23 = vmul.f32 %v3441_v29, %v652_v8  ;;  %v673_v31 = vmul.f32 %v3445_v52, %v644_v46  ;;  %v818_v12 = vmul.f32 %v3496_v50, %v789_v56  ;;  %5239 = vst [vmem:[#allocation58_spill] sm:$0xff] %v4224_v9  ;;  %v5242_v46 = vld [vmem:[#allocation84_spill] sm:$0xff]  ;;  %v5243_v8 = vld [vmem:[#allocation81_spill] sm:$0xff]  ;;  %p2523_p5 = pnand %p2522_p3, %p2516_p0 }
 0x25b   : > { %v645_v14 = vsel %vm639_vm4, %v5235_v19, %v5236_v24  ;;  %v4220_v3 = vadd.f32 %v1209_v21, %v1161_v35  ;;  %v4222_v10 = vadd.f32 %v1210_v54, %v1162_v1  ;;  %v798_v20 = vsel %vm784_vm5, %v5241_v25, %v5240_v6  ;;  %v5244_v19 = vld [vmem:[#allocation9_spill] sm:$0xff]  ;;  %v5245_v35 = vld [vmem:[#allocation31_spill] sm:$0xff] }
 0x25c   : > { %v1261_v56 = vsel %vm1259_vm7, %v5243_v8, %v5242_v46  ;;  %v1207_v41 = vmul.f32 %v1189_v53, %v5180_v18  ;;  %v1208_v21 = vmul.f32 %v1189_v53, %v5244_v19  ;;  %v1002_v54 = vmul.f32 %v5245_v35, %v954_v59  ;;  %v5246_v24 = vld [vmem:[#allocation69_spill] sm:$0xff]  ;;  %v5249_v18 = vld [vmem:[#allocation111_spill] sm:$0xff] }
 0x25d   : > { %5237 = vst [vmem:[#allocation56_spill] sm:$0xff] %v4220_v3  ;;  %5238 = vst [vmem:[#allocation48_spill] sm:$0xff] %v4222_v10  ;;  %v674_v1 = vmul.f32 %v3441_v29, %v653_v33  ;;  %v5247_v10 = vld [vmem:[#allocation74_spill] sm:$0xff]  ;;  %v790_v57 = vsel %vm784_vm5, %v5240_v6, %v5241_v25  ;;  %1646 = vrot.lane.b32.xlu1 %v5248_v34, %s2607_s23  ;;  %v728_v9 = vmul.f32 %v5249_v18, %v672_v23  ;;  %v5250_v23 = vld [vmem:[#allocation75_spill] sm:$0xff] }
 0x25e   : > { %v1071_v3 = vsel %vm1058_vm6, %v5247_v10, %v5246_v24  ;;  %v729_v53 = vmul.f32 %v5249_v18, %v673_v31  ;;  %v1223_v59 = vadd.f32 %v1207_v41, %v3952_v2  ;;  %v1224_v29 = vadd.f32 %v1208_v21, %v3954_v47  ;;  %v5252_v31 = vld [vmem:[#allocation14_spill] sm:$0xff]  ;;  %v4266_v41 = vpop.permute.xlu0 %1446  ;;  %v5255_v18 = vld [vmem:[#allocation91_spill] sm:$0xff] }
 0x25f   : > { %v675_v33 = vmul.f32 %v3445_v52, %v645_v14  ;;  %v1063_v19 = vsel %vm1058_vm6, %v5246_v24, %v5247_v10  ;;  %v819_v6 = vmul.f32 %v3493_v49, %v798_v20  ;;  %v1286_v25 = vmul.f32 %v5191_v38, %v1261_v56  ;;  %v1121_v14 = vpop.permute.xlu1 %1120 }
 0x260   : > { %v820_v11 = vmul.f32 %v3496_v50, %v790_v57  ;;  %v935_v2 = vsel %vm921_vm3, %v5251_v17, %v5250_v23  ;;  %v865_v47 = vmul.f32 %v5252_v31, %v817_v15  ;;  %v866_v52 = vmul.f32 %v5252_v31, %v818_v12  ;;  %v5253_v15 = vld [vmem:[#allocation8_spill] sm:$0xff] }
 0x261   : > { %v1003_v10 = vmul.f32 %v5245_v35, %v955_v27  ;;  %v1091_v49 = vmul.f32 %v3505_v28, %v1071_v3  ;;  %v927_v50 = vsel %vm921_vm3, %v5250_v23, %v5251_v17  ;;  %v1334_v57 = vmul.f32 %v4063_v44, %v1286_v25  ;;  %1648 = vrot.lane.b32.xlu1 %v5205_v40, %s2607_s23  ;;  %v5254_v35 = vld [vmem:[#allocation25_spill] sm:$0xff] }
 0x262   : > { %v730_v20 = vmul.f32 %v5253_v15, %v674_v1  ;;  %v1092_v12 = vmul.f32 %v3508_v32, %v1063_v19  ;;  %v881_v56 = vadd.f32 %v865_v47, %v728_v9  ;;  %v882_v21 = vadd.f32 %v866_v52, %v729_v53  ;;  %v4288_v19 = vpop.permute.xlu0 %1442  ;;  %v5256_v9 = vld [vmem:[#allocation80_spill] sm:$0xff]  ;;  %v5257_v53 = vld [vmem:[#allocation73_spill] sm:$0xff]  ;;  %v1780_v52 = vld [vmem:[%s4849_s5 + $0x28] sm:$0xff] }
 0x263   : > { %v731_v27 = vmul.f32 %v5253_v15, %v675_v33  ;;  %v867_v3 = vmul.f32 %v5254_v35, %v819_v6  ;;  %v956_v24 = vmul.f32 %v3420_v30, %v935_v2  ;;  %v1423_v17 = vmul.f32 %v3588_v39, %v5255_v18  ;;  %v5259_v18 = vld [vmem:[#allocation18_spill] sm:$0xff] }
 0x264   : > { %v868_v25 = vmul.f32 %v5254_v35, %v820_v11  ;;  %v957_v23 = vmul.f32 %v3423_v13, %v927_v50  ;;  %v1296_v31 = vmul.f32 %v5191_v38, %v1266_v36  ;;  %v1297_v1 = vmul.f32 %v5192_v5, %v1274_v63  ;;  %v1326_v36 = vpop.permute.xlu1 %1325  ;;  %v5258_v50 = vld [vmem:[#allocation26_spill] sm:$0xff] }
 0x265   : > { %v1064_v33 = vsel %vm1058_vm6, %v5257_v53, %v5256_v9  ;;  %v1072_v30 = vsel %vm1058_vm6, %v5256_v9, %v5257_v53  ;;  %v1350_v11 = vadd.f32 %v1334_v57, %v4127_v51  ;;  %v1471_v13 = vmul.f32 %v4288_v19, %v1423_v17  ;;  %1664 = vrot.lane.b32.xlu1 %v5213_v62, %s2607_s23  ;;  %v5260_v9 = vld [vmem:[#allocation109_spill] sm:$0xff]  ;;  %v2102_v53 = vld [vmem:[%s4851_s7 + $0x8] sm:$0xff]  ;;  %s4796_s23 = scalar_lea.hbm %s4852_s8, %s2354_s24 }
 0x266   : > { %v1018_v63 = vadd.f32 %v1002_v54, %v881_v56  ;;  %v1019_v6 = vadd.f32 %v1003_v10, %v882_v21  ;;  %v1344_v2 = vmul.f32 %v1326_v36, %v1296_v31  ;;  %v1345_v47 = vmul.f32 %v1326_v36, %v1297_v1  ;;  %v4317_v21 = vpop.permute.xlu0 %1462 }
 0x267   : > { %v1139_v15 = vmul.f32 %v5258_v50, %v1091_v49  ;;  %v1140_v35 = vmul.f32 %v5258_v50, %v1092_v12  ;;  %v1004_v51 = vmul.f32 %v5259_v18, %v956_v24  ;;  %v4308_v57 = vadd.f32 %v1471_v13, %v1350_v11 }
 0x268   : > { %v1005_v17 = vmul.f32 %v5259_v18, %v957_v23  ;;  %v724_v54 = vmul.f32 %v5260_v9, %v4140_v7  ;;  %v4313_v10 = vadd.f32 %v1344_v2, %v1223_v59  ;;  %v4315_v56 = vadd.f32 %v1345_v47, %v1224_v29  ;;  %v1181_v31 = vpop.permute.xlu1 %1180  ;;  %v5262_v47 = vld [vmem:[#allocation85_spill] sm:$0xff] }
 0x269   : > { %v1270_v49 = vsel %vm1259_vm7, %v5229_v42, %v5230_v60  ;;  %v725_v12 = vmul.f32 %v5260_v9, %v4143_v58  ;;  %v1093_v24 = vmul.f32 %v3505_v28, %v1072_v30  ;;  %v1094_v23 = vmul.f32 %v3508_v32, %v1064_v33  ;;  %1810 = vperm.xlu1 %2468, %v1780_v52  }
 0x26a   : > { %v883_v7 = vadd.f32 %v867_v3, %v730_v20  ;;  %v884_v59 = vadd.f32 %v868_v25, %v731_v27  ;;  %v1155_v29 = vadd.f32 %v1139_v15, %v1018_v63  ;;  %v1156_v1 = vadd.f32 %v1140_v35, %v1019_v6  ;;  %v4335_v3 = vpop.permute.xlu0 %1392 }
 0x26b   : > { %v1141_v11 = vmul.f32 %v1121_v14, %v1093_v24  ;;  %v1142_v13 = vmul.f32 %v1121_v14, %v1094_v23  ;;  %v1203_v42 = vmul.f32 %v1181_v31, %v5248_v34  ;;  %v1204_v58 = vmul.f32 %v1181_v31, %v3033_v48  ;;  %v5267_v23 = vld [vmem:[#allocation20_spill] sm:$0xff]  ;;  %v5268_v31 = vld [vmem:[#allocation86_spill] sm:$0xff] }
 0x26c   : > { %v1087_v60 = vmul.f32 %v3505_v28, %v4168_v55  ;;  %v877_v33 = vadd.f32 %v4159_v0, %v724_v54  ;;  %v1020_v20 = vadd.f32 %v1004_v51, %v883_v7  ;;  %v1021_v27 = vadd.f32 %v1005_v17, %v884_v59  ;;  %v1185_v55 = vpop.permute.xlu1 %1184  ;;  %v5264_v17 = vld [vmem:[#allocation29_spill] sm:$0xff]  ;;  %v5265_v54 = vld [vmem:[#allocation19_spill] sm:$0xff] }
 0x26d   : > { %v878_v25 = vadd.f32 %v4162_v26, %v725_v12  ;;  %v4338_v30 = vadd.f32 %v1203_v42, %v1155_v29  ;;  %v4340_v36 = vadd.f32 %v1204_v58, %v1156_v1  ;;  %2110 = vperm.xlu1 %2468, %v2102_v53   ;;  %v4343_v34 = vmul.f32 0.70710677, %v4116_v43  ;;  %v5269_v29 = vld [vmem:[#allocation98_spill] sm:$0xff] }
 0x26e   : > { %v1088_v48 = vmul.f32 %v3508_v32, %v4152_v22  ;;  %v1288_v28 = vmul.f32 %v5191_v38, %v4174_v16  ;;  %v1289_v0 = vmul.f32 %v5192_v5, %v1270_v49  ;;  %v4351_v14 = vmul.f32 0.70710677, %v4119_v61  ;;  %v5261_v22 = vld [vmem:[#allocation79_spill] sm:$0xff]  ;;  %v5266_v49 = vld [vmem:[#allocation88_spill] sm:$0xff] }
 0x26f   : > { %v1157_v26 = vadd.f32 %v1141_v11, %v1020_v20  ;;  %v1158_v63 = vadd.f32 %v1142_v13, %v1021_v27  ;;  %v1205_v6 = vmul.f32 %v1185_v55, %v5205_v40  ;;  %v1206_v2 = vmul.f32 %v1185_v55, %v5213_v62  ;;  %v1238_v40 = vpop.permute.xlu0 %1237  ;;  %v5270_v13 = vld [vmem:[#allocation110_spill] sm:$0xff] }
 0x270   : > { %v1269_v32 = vsel %vm1259_vm7, %v5242_v46, %v5243_v8  ;;  %v1399_v16 = vsel %vm1396_vm1, %v5262_v47, %v5261_v22  ;;  %v1407_v52 = vsel %vm1396_vm1, %v5261_v22, %v5262_v47  ;;  %v1014_v50 = vadd.f32 %v4134_v45, %v877_v33  ;;  %v5263_v46 = vld [vmem:[#allocation24_spill] sm:$0xff]  ;;  %v1242_v24 = vpop.permute.xlu1 %1241 }
 0x271   : > { %v1015_v62 = vadd.f32 %v4137_v37, %v878_v25  ;;  %v1221_v15 = vadd.f32 %v1205_v6, %v1157_v26  ;;  %v1222_v35 = vadd.f32 %v1206_v2, %v1158_v63  ;;  %v4370_v18 = vand.u32 2147483647, %v4343_v34 }
 0x272   : > { %v1135_v8 = vmul.f32 %v5263_v46, %v1087_v60  ;;  %v1136_v51 = vmul.f32 %v5263_v46, %v1088_v48  ;;  %v1336_v9 = vmul.f32 %v5264_v17, %v1288_v28  ;;  %v1199_v12 = vmul.f32 %v5266_v49, %v5265_v54 }
 0x273   : > { %v1337_v45 = vmul.f32 %v5264_v17, %v1289_v0  ;;  %v1200_v37 = vmul.f32 %v5266_v49, %v5267_v23  ;;  %v1287_v7 = vmul.f32 %v5192_v5, %v1269_v32  ;;  %v4382_v59 = vand.u32 2147483647, %v4351_v14  ;;  %v1254_v58 = vpop.permute.xlu0 %1253  ;;  %v5271_v32 = vld [vmem:[#allocation58_spill] sm:$0xff] }
 0x274   : > { %v1536_v1 = vsel %vm1533_vm2, %v5269_v29, %v5268_v31  ;;  %v1151_v53 = vadd.f32 %v1135_v8, %v1014_v50  ;;  %v1425_v11 = vmul.f32 %v3588_v39, %v1399_v16  ;;  %v1426_v42 = vmul.f32 %v5270_v13, %v1407_v52  ;;  %v1258_v55 = vpop.permute.xlu1 %1257  ;;  %v5273_v49 = vld [vmem:[#allocation42_spill] sm:$0xff] }
 0x275   : > { %v1152_v60 = vadd.f32 %v1136_v51, %v1015_v62  ;;  %v1265_v33 = vsel %vm1259_vm7, %v1238_v40, %v1254_v58  ;;  %v1273_v20 = vsel %vm1259_vm7, %v1254_v58, %v1238_v40  ;;  %v1861_v27 = vmul.f32 0.3275911, %v4370_v18  ;;  %v5272_v40 = vld [vmem:[#allocation92_spill] sm:$0xff] }
 0x276   : > { %v1544_v25 = vsel %vm1533_vm2, %v5268_v31, %v5269_v29  ;;  %v1215_v48 = vadd.f32 %v1199_v12, %v1151_v53  ;;  %v1294_v28 = vmul.f32 %v5191_v38, %v1265_v33  ;;  %v1295_v0 = vmul.f32 %v5192_v5, %v1273_v20  ;;  %v5274_v31 = vld [vmem:[#allocation112_spill] sm:$0xff]  ;;  %v5275_v53 = vld [vmem:[#allocation113_spill] sm:$0xff] }
 0x277   : > { %v1216_v26 = vadd.f32 %v1200_v37, %v1152_v60  ;;  %v1267_v63 = vsel %vm1259_vm7, %v1242_v24, %v1258_v55  ;;  %v1275_v6 = vsel %vm1259_vm7, %v1258_v55, %v1242_v24  ;;  %v1862_v2 = vmul.f32 0.3275911, %v4382_v59  ;;  %v4410_v50 = vpop.permute.xlu0 %1458  ;;  %v5278_v20 = vld [vmem:[#allocation28_spill] sm:$0xff] }
 0x278   : > { %v1342_v22 = vmul.f32 %v5271_v32, %v1294_v28  ;;  %v1343_v47 = vmul.f32 %v5271_v32, %v1295_v0  ;;  %v1298_v16 = vmul.f32 %v5191_v38, %v1267_v63  ;;  %v1299_v52 = vmul.f32 %v5192_v5, %v1275_v6  ;;  %v4422_v23 = vpop.permute.xlu1 %1466  ;;  %v5282_v63 = vld [vmem:[#allocation93_spill] sm:$0xff] }
 0x279   : > { %v1424_v62 = vmul.f32 %v5270_v13, %v5272_v40  ;;  %v1473_v46 = vmul.f32 %v4266_v41, %v1425_v11  ;;  %v1474_v8 = vmul.f32 %v4266_v41, %v1426_v42  ;;  %v1869_v51 = vadd.f32 1.0, %v1861_v27  ;;  %v5276_v42 = vld [vmem:[#allocation56_spill] sm:$0xff]  ;;  %v5279_v27 = vld [vmem:[#allocation103_spill] sm:$0xff] }
 0x27a   : > { %v4416_v17 = vadd.f32 %v1342_v22, %v1221_v15  ;;  %v4418_v54 = vadd.f32 %v1343_v47, %v1222_v35  ;;  %v1346_v12 = vmul.f32 %v5273_v49, %v1298_v16  ;;  %v1347_v24 = vmul.f32 %v5273_v49, %v1299_v52  ;;  %v5277_v35 = vld [vmem:[#allocation48_spill] sm:$0xff] }
 0x27b   : > { %v1335_v37 = vmul.f32 %v4063_v44, %v1287_v7  ;;  %v1562_v29 = vmul.f32 %v5274_v31, %v1536_v1  ;;  %v1563_v58 = vmul.f32 %v5275_v53, %v1544_v25  ;;  %v1870_v11 = vadd.f32 1.0, %v1862_v2  ;;  %v1584_v55 = vpop.permute.xlu0 %1583  ;;  %v5280_v44 = vld [vmem:[#allocation95_spill] sm:$0xff] }
 0x27c   : > { %v1352_v60 = vadd.f32 %v1336_v9, %v1215_v48  ;;  %v1353_v41 = vadd.f32 %v1337_v45, %v1216_v26  ;;  %v4428_v15 = vadd.f32 %v1346_v12, %v5276_v42  ;;  %v4431_v33 = vadd.f32 %v1347_v24, %v5277_v35  ;;  %v5284_v2 = vld [vmem:[#allocation11_spill] sm:$0xff] }
 0x27d   : > { %v1214_v28 = vadd.f32 %v5279_v27, %v5278_v20  ;;  %v1472_v0 = vmul.f32 %v4288_v19, %v1424_v62  ;;  %2478 = vrcp.f32 %v1869_v51  ;;  %v4437_v7 = vmul.f32 0.70710677, %v5280_v44  ;;  %v4439_v26 = vpop.permute.xlu1 %1317  ;;  %v5285_v19 = vld [vmem:[#allocation94_spill] sm:$0xff]  ;;  %v5287_v51 = vld [vmem:[#allocation97_spill] sm:$0xff] }
 0x27e   : > { %v1489_v1 = vadd.f32 %v1473_v46, %v1352_v60  ;;  %v1490_v25 = vadd.f32 %v1474_v8, %v1353_v41  ;;  %v1610_v9 = vmul.f32 %v1584_v55, %v1562_v29  ;;  %v1611_v45 = vmul.f32 %v1584_v55, %v1563_v58  ;;  %v5286_v46 = vld [vmem:[#allocation37_spill] sm:$0xff]  ;;  %v5288_v27 = vld [vmem:[#allocation22_spill] sm:$0xff] }
 0x27f   : > { %5281 = vst [vmem:[#allocation50_spill] sm:$0xff] %v4437_v7  ;;  %v1351_v48 = vadd.f32 %v1335_v37, %v1214_v28  ;;  %v4442_v6 = vmul.f32 0.70710677, %v5282_v63  ;;  %2480 = vrcp.f32 %v1870_v11  ;;  %v1560_v32 = vmul.f32 %v5274_v31, %v5284_v2  ;;  %v1580_v40 = vpop.permute.xlu0 %1579 }
 0x280   : > { %v1561_v22 = vmul.f32 %v5275_v53, %v5285_v19  ;;  %v1626_v47 = vadd.f32 %v1610_v9, %v1489_v1  ;;  %v1627_v16 = vadd.f32 %v1611_v45, %v1490_v25  ;;  %v4449_v62 = vand.u32 2147483647, %v4437_v7  ;;  %v5292_v1 = vld [vmem:[#allocation39_spill] sm:$0xff] }
 0x281   : > { %5283 = vst [vmem:[#allocation83_spill] sm:$0xff] %v4442_v6  ;;  %v1488_v52 = vadd.f32 %v1472_v0, %v1351_v48  ;;  %v1608_v12 = vmul.f32 %v1580_v40, %v1560_v32  ;;  %v1377_v37 = vpop.permute.xlu1 %1376  ;;  %v4454_v29 = vand.u32 2147483647, %v4442_v6  ;;  %v5291_v0 = vld [vmem:[#allocation43_spill] sm:$0xff]  ;;  %vm2005_vm9 = vcmp.ge.f32.partialorder %v4343_v34, 0.0 }
 0x282   : > { %v1763_v8 = vadd.f32 %v5286_v46, %v1626_v47  ;;  %v1764_v49 = vadd.f32 %v5287_v51, %v1627_v16  ;;  %v1609_v24 = vmul.f32 %v1580_v40, %v1561_v22  ;;  %v1403_v60 = vsel %vm1396_vm1, %v1377_v37, %v4335_v3  ;;  %v5293_v22 = vld [vmem:[#allocation36_spill] sm:$0xff] }
 0x283   : > { %v1624_v58 = vadd.f32 %v1608_v12, %v4308_v57  ;;  %v1411_v41 = vsel %vm1396_vm1, %v4335_v3, %v1377_v37  ;;  %v1433_v42 = vmul.f32 %v3588_v39, %v1403_v60  ;;  %v4465_v20 = vpop.permute.xlu0 %1599  ;;  %v1856_v9 = vmul.f32 0.3275911, %v4449_v62 }
 0x284   : > { %v1625_v11 = vadd.f32 %v1609_v24, %v1488_v52  ;;  %v1434_v35 = vmul.f32 %v5270_v13, %v1411_v41  ;;  %v4468_v28 = vadd.f32 %v5288_v27, %v1763_v8  ;;  %v4471_v57 = vadd.f32 %v5288_v27, %v1764_v49 }
 0x285   : > { %v1761_v55 = vadd.f32 %v5291_v0, %v1624_v58  ;;  %v1481_v3 = vmul.f32 %v4317_v21, %v1433_v42  ;;  %v1379_v48 = vpop.permute.xlu1 %1378  ;;  %v1855_v19 = vmul.f32 0.3275911, %v4454_v29  ;;  %v1959_v63 = vsub.f32 0.0, %v4454_v29 }
 0x286   : > { %5289 = vst [vmem:[#allocation63_spill] sm:$0xff] %v4468_v28  ;;  %5290 = vst [vmem:[#allocation61_spill] sm:$0xff] %v4471_v57  ;;  %v1762_v25 = vadd.f32 %v5292_v1, %v1625_v11  ;;  %v1482_v45 = vmul.f32 %v4317_v21, %v1434_v35  ;;  %v4479_v2 = vmul.f32 0.70710677, %v4468_v28  ;;  %v4482_v32 = vmul.f32 0.70710677, %v4471_v57 }
 0x287   : > { %v4486_v47 = vadd.f32 %v5293_v22, %v1761_v55  ;;  %v4492_v52 = vadd.f32 %v1481_v3, %v4313_v10  ;;  %v4497_v40 = vpop.permute.xlu0 %1529  ;;  %v1864_v10 = vadd.f32 1.0, %v1856_v9  ;;  %v1863_v11 = vadd.f32 1.0, %v1855_v19 }
 0x288   : > { %v4489_v16 = vadd.f32 %v5293_v22, %v1762_v25  ;;  %v4495_v21 = vadd.f32 %v1482_v45, %v4315_v56  ;;  %v4500_v46 = vand.u32 2147483647, %v4479_v2  ;;  %v4503_v8 = vand.u32 2147483647, %v4482_v32 }
 0x289   : > { %5294 = vst [vmem:[#allocation96_spill] sm:$0xff] %v4486_v47  ;;  %5296 = vst [vmem:[#allocation52_spill] sm:$0xff] %v4492_v52  ;;  %v1395_v49 = vpop.permute.xlu1 %1394  ;;  %2482 = vrcp.f32 %v1864_v10  ;;  %v4536_v10 = vmul.f32 0.70710677, %v4486_v47  ;;  %vm2006_vm10 = vcmp.ge.f32.partialorder %v4351_v14, 0.0  ;;  %vm2003_vm11 = vcmp.ge.f32.partialorder %v4479_v2, 0.0 }
 0x28a   : > { %5295 = vst [vmem:[#allocation60_spill] sm:$0xff] %v4489_v16  ;;  %5297 = vst [vmem:[#allocation23_spill] sm:$0xff] %v4495_v21  ;;  %v4505_v51 = vpop.eup %2478  ;;  %v1859_v12 = vmul.f32 0.3275911, %v4500_v46  ;;  %v1860_v24 = vmul.f32 0.3275911, %v4503_v8  ;;  %v1404_v56 = vsel %vm1396_vm1, %v1379_v48, %v1395_v49  ;;  %v1412_v58 = vsel %vm1396_vm1, %v1395_v49, %v1379_v48 }
 0x28b   : > { %v1435_v60 = vmul.f32 %v3588_v39, %v1404_v56  ;;  %v1436_v41 = vmul.f32 %v5270_v13, %v1412_v58  ;;  %v1375_v42 = vpop.permute.xlu0 %1374  ;;  %v1885_v0 = vmul.f32 1.0614054, %v4505_v51  ;;  %2484 = vrcp.f32 %v1863_v11  ;;  %5298 = vst [vmem:[#allocation34_spill] sm:$0xff] %v4536_v10 }
 0x28c   : > { %v4509_v37 = vpop.eup %2480  ;;  %v1867_v35 = vadd.f32 1.0, %v1859_v12  ;;  %v1868_v27 = vadd.f32 1.0, %v1860_v24  ;;  %vm2004_vm12 = vcmp.ge.f32.partialorder %v4482_v32, 0.0 }
 0x28d   : > { %v1483_v55 = vmul.f32 %v4422_v23, %v1435_v60  ;;  %v1484_v1 = vmul.f32 %v4422_v23, %v1436_v41  ;;  %v4520_v25 = vpop.permute.xlu1 %1603  ;;  %v1886_v9 = vmul.f32 1.0614054, %v4509_v37  ;;  %v2336_v22 = vadd.f32 -1.4531521, %v1885_v0 }
 0x28e   : > { %2486 = vrcp.f32 %v1867_v35 }
 0x28f   : > { %v4524_v3 = vadd.f32 %v1483_v55, %v4428_v15  ;;  %v4527_v45 = vadd.f32 %v1484_v1, %v4431_v33  ;;  %v1391_v48 = vpop.permute.xlu0 %1390  ;;  %2488 = vrcp.f32 %v1868_v27  ;;  %v2337_v15 = vadd.f32 -1.4531521, %v1886_v9 }
 0x290   : > { %v1402_v19 = vsel %vm1396_vm1, %v1375_v42, %v1391_v48  ;;  %v1410_v23 = vsel %vm1396_vm1, %v1391_v48, %v1375_v42  ;;  %v4539_v33 = vmul.f32 0.70710677, %v4489_v16  ;;  %v1901_v11 = vmul.f32 %v4505_v51, %v2336_v22 }
 0x291   : > { %v1431_v49 = vmul.f32 %v3588_v39, %v1402_v19  ;;  %v1432_v12 = vmul.f32 %v5270_v13, %v1410_v23  ;;  %v1236_v24 = vpop.permute.xlu1 %1235  ;;  %v1902_v35 = vmul.f32 %v4509_v37, %v2337_v15  ;;  %v4552_v27 = vand.u32 2147483647, %v4536_v10 }
 0x292   : > { %5299 = vst [vmem:[#allocation35_spill] sm:$0xff] %v4539_v33  ;;  %v4559_v55 = vand.u32 2147483647, %v4539_v33  ;;  %v1909_v1 = vadd.f32 1.4214138, %v1901_v11 }
 0x293   : > { %v1479_v56 = vmul.f32 %v4410_v50, %v1431_v49  ;;  %v1480_v58 = vmul.f32 %v4410_v50, %v1432_v12  ;;  %v1910_v23 = vadd.f32 1.4214138, %v1902_v35  ;;  %v1857_v22 = vmul.f32 0.3275911, %v4552_v27 }
 0x294   : > { %v1965_v12 = vsub.f32 0.0, %v4370_v18  ;;  %v1961_v34 = vsub.f32 0.0, %v4552_v27 }
 0x295   : > { %v4545_v60 = vadd.f32 %v1479_v56, %v4416_v17  ;;  %v4548_v41 = vadd.f32 %v1480_v58, %v4418_v54  ;;  %v1252_v42 = vpop.permute.xlu1 %1251  ;;  %v1917_v58 = vmul.f32 %v4505_v51, %v1909_v1  ;;  %v1918_v35 = vmul.f32 %v4509_v37, %v1910_v23 }
 0x296   : > { %v1264_v0 = vsel %vm1259_vm7, %v1236_v24, %v1252_v42  ;;  %v1272_v50 = vsel %vm1259_vm7, %v1252_v42, %v1236_v24  ;;  %v4568_v49 = vpop.eup %2482  ;;  %v1858_v24 = vmul.f32 0.3275911, %v4559_v55 }
 0x297   : > { %5300 = vst [vmem:[#allocation6_spill] sm:$0xff] %v4545_v60  ;;  %5301 = vst [vmem:[#allocation17_spill] sm:$0xff] %v4548_v41  ;;  %v1292_v17 = vmul.f32 %v5191_v38, %v1264_v0  ;;  %v1293_v54 = vmul.f32 %v5192_v5, %v1272_v50  ;;  %v1865_v0 = vadd.f32 1.0, %v1857_v22  ;;  %v1973_v50 = vmul.f32 %v1965_v12, %v4370_v18 }
 0x298   : > { %v4572_v15 = vpop.eup %2484  ;;  %v2345_v47 = vadd.f32 -0.28449672, %v1918_v35 }
 0x299   : > { %v1340_v9 = vmul.f32 %v4439_v26, %v1292_v17  ;;  %v1341_v48 = vmul.f32 %v4439_v26, %v1293_v54  ;;  %v4565_v19 = vpop.permute.xlu1 %1454  ;;  %v1966_v26 = vsub.f32 0.0, %v4382_v59  ;;  %v1880_v17 = vmul.f32 1.0614054, %v4568_v49 }
 0x29a   : > { %2490 = vrcp.f32 %v1865_v0  ;;  %v1987_v23 = vmul.f32 1.442695, %v1973_v50  ;;  %v1934_v33 = vmul.f32 %v4509_v37, %v2345_v47 }
 0x29b   : > { %v4575_v38 = vadd.f32 %v1340_v9, %v4338_v30  ;;  %v4578_v5 = vadd.f32 %v1341_v48, %v4340_v36  ;;  %v4581_v56 = vpop.eup %2486  ;;  %v1866_v30 = vadd.f32 1.0, %v1858_v24  ;;  %v1879_v36 = vmul.f32 1.0614054, %v4572_v15  ;;  %v4597_v24 = vpop.permute.xlu0 %1595 }
 0x29c   : > { %v4584_v11 = vpop.eup %2488  ;;  %v1974_v54 = vmul.f32 %v1966_v26, %v4382_v59  ;;  %v1883_v9 = vmul.f32 1.0614054, %v4581_v56  ;;  %v2344_v48 = vadd.f32 -0.28449672, %v1917_v58  ;;  %v2331_v22 = vadd.f32 -1.4531521, %v1880_v17 }
 0x29d   : > { %v4586_v42 = vpop.permute.xlu1 %1513  ;;  %v1884_v1 = vmul.f32 1.0614054, %v4584_v11  ;;  %2492 = vrcp.f32 %v1866_v30  ;;  %v2330_v18 = vadd.f32 -1.4531521, %v1879_v36  ;;  %5302 = vst [vmem:[#allocation7_spill] sm:$0xff] %v4597_v24 }
 0x29e   : > { %v1989_v12 = vmul.f32 1.442695, %v1974_v54  ;;  %v2334_v41 = vadd.f32 -1.4531521, %v1883_v9  ;;  %v1933_v59 = vmul.f32 %v4505_v51, %v2344_v48  ;;  %2494 = vpow2.f32 %v1987_v23  ;;  %v5317_v4 = vld [vmem:[#allocation17_spill] sm:$0xff] }
 0x29f   : > { %v2335_v60 = vadd.f32 -1.4531521, %v1884_v1  ;;  %v1896_v58 = vmul.f32 %v4568_v49, %v2331_v22  ;;  %v1895_v35 = vmul.f32 %v4572_v15, %v2330_v18  ;;  %v1942_v36 = vadd.f32 0.2548296, %v1934_v33  ;;  %v4609_v54 = vpop.permute.xlu0 %1736 }
 0x2a0   : > { %2496 = vpow2.f32 %v1989_v12  ;;  %v1899_v0 = vmul.f32 %v4581_v56, %v2334_v41  ;;  %v1941_v30 = vadd.f32 0.2548296, %v1933_v59  ;;  %v1963_v22 = vsub.f32 0.0, %v4500_v46 }
 0x2a1   : > { %v4595_v16 = vpop.permute.xlu1 %1515  ;;  %v1900_v50 = vmul.f32 %v4584_v11, %v2335_v60  ;;  %v1904_v9 = vadd.f32 1.4214138, %v1896_v58  ;;  %v1903_v1 = vadd.f32 1.4214138, %v1895_v35  ;;  %v1964_v12 = vsub.f32 0.0, %v4503_v8 }
 0x2a2   : > { %v1907_v48 = vadd.f32 1.4214138, %v1899_v0  ;;  %v1949_v23 = vmul.f32 %v4505_v51, %v1941_v30  ;;  %v1960_v41 = vsub.f32 0.0, %v4449_v62  ;;  %v1950_v60 = vmul.f32 %v4509_v37, %v1942_v36 }
 0x2a3   : > { %v1908_v47 = vadd.f32 1.4214138, %v1900_v50  ;;  %v1912_v58 = vmul.f32 %v4568_v49, %v1904_v9  ;;  %v1911_v35 = vmul.f32 %v4572_v15, %v1903_v1  ;;  %v4622_v0 = vpop.permute.xlu0 %1666  ;;  %v1971_v10 = vmul.f32 %v1963_v22, %v4500_v46 }
 0x2a4   : > { %v1915_v51 = vmul.f32 %v4581_v56, %v1907_v48  ;;  %v1957_v30 = vmul.f32 0.5, %v1949_v23  ;;  %v1972_v37 = vmul.f32 %v1964_v12, %v4503_v8  ;;  %v1968_v36 = vmul.f32 %v1960_v41, %v4449_v62 }
 0x2a5   : > { %v4600_v26 = vpop.permute.xlu1 %1531  ;;  %v1916_v50 = vmul.f32 %v4584_v11, %v1908_v47  ;;  %v1958_v44 = vmul.f32 0.5, %v1950_v60  ;;  %v2339_v22 = vadd.f32 -0.28449672, %v1912_v58  ;;  %v2338_v62 = vadd.f32 -0.28449672, %v1911_v35 }
 0x2a6   : > { %v2342_v41 = vadd.f32 -0.28449672, %v1915_v51  ;;  %v1983_v6 = vmul.f32 1.442695, %v1971_v10  ;;  %v1985_v28 = vmul.f32 1.442695, %v1972_v37  ;;  %v1967_v35 = vmul.f32 %v1959_v63, %v4454_v29 }
 0x2a7   : > { %v4616_v59 = vpop.eup %2490  ;;  %v2343_v60 = vadd.f32 -0.28449672, %v1916_v50  ;;  %v4642_v52 = vpop.permute.xlu0 %1509  ;;  %v1928_v10 = vmul.f32 %v4568_v49, %v2339_v22  ;;  %v1977_v37 = vmul.f32 1.442695, %v1968_v36  ;;  %v1549_v63 = vsel %vm1533_vm2, %v4600_v26, %v4595_v16 }
 0x2a8   : > { %v1881_v48 = vmul.f32 1.0614054, %v4616_v59  ;;  %2498 = vpow2.f32 %v1983_v6 }
 0x2a9   : > { %v1932_v51 = vmul.f32 %v4584_v11, %v2343_v60  ;;  %2500 = vpow2.f32 %v1985_v28  ;;  %v1936_v28 = vadd.f32 0.2548296, %v1928_v10 }
 0x2aa   : > { %v4607_v17 = vpop.permute.xlu1 %1740  ;;  %v4618_v33 = vpop.eup %2492  ;;  %2502 = vpow2.f32 %v1977_v37  ;;  %v1548_v37 = vsel %vm1533_vm2, %v4497_v40, %v4586_v42 }
 0x2ab   : > { %v1882_v47 = vmul.f32 1.0614054, %v4618_v33  ;;  %v2495_v23 = vpop.eup %2494  ;;  %v4666_v36 = vpop.permute.xlu0 %1525 }
 0x2ac   : > { %v1997_v7 = vmul.f32 %v2495_v23, %v1957_v30 }
 0x2ad   : > { %v2497_v12 = vpop.eup %2496 }
 0x2ae   : > { %v1373_v18 = vpop.permute.xlu1 %1372  ;;  %v1998_v21 = vmul.f32 %v2497_v12, %v1958_v44  ;;  %v1927_v44 = vmul.f32 %v4572_v15, %v2338_v62  ;;  %v2013_v30 = vsub.f32 1.0, %v1997_v7  ;;  %v1962_v12 = vsub.f32 0.0, %v4559_v55 }
 0x2b2   : > { %v1389_v24 = vpop.permute.xlu1 %1388 }
 0x2b3   : > { %v1401_v9 = vsel %vm1396_vm1, %v1373_v18, %v1389_v24  ;;  %v1409_v1 = vsel %vm1396_vm1, %v1389_v24, %v1373_v18  ;;  %vm2050_vm1 = vcmask 261120  }
 0x2b4   : > { %v1429_v46 = vmul.f32 %v3588_v39, %v1401_v9  ;;  %v1430_v8 = vmul.f32 %v5270_v13, %v1409_v1  ;;  %v2332_v39 = vadd.f32 -1.4531521, %v1881_v48  ;;  %v2333_v9 = vadd.f32 -1.4531521, %v1882_v47 }
 0x2b5   : > { %v1940_v48 = vadd.f32 0.2548296, %v1932_v51  ;;  %v1935_v47 = vadd.f32 0.2548296, %v1927_v44 }
 0x2b6   : > { %v1477_v57 = vmul.f32 %v4565_v19, %v1429_v46  ;;  %v1478_v24 = vmul.f32 %v4565_v19, %v1430_v8  ;;  %v4640_v18 = vpop.permute.xlu1 %1591  ;;  %v1931_v19 = vmul.f32 %v4581_v56, %v2342_v41  ;;  %v1897_v29 = vmul.f32 %v4616_v59, %v2332_v39 }
 0x2b7   : > { %v1898_v6 = vmul.f32 %v4618_v33, %v2333_v9  ;;  %v1573_v46 = vmul.f32 %v5275_v53, %v1549_v63  ;;  %v1948_v60 = vmul.f32 %v4584_v11, %v1940_v48  ;;  %v1943_v39 = vmul.f32 %v4572_v15, %v1935_v47  ;;  %v2499_v63 = vpop.eup %2498 }
 0x2b8   : > { %v4645_v13 = vadd.f32 %v1477_v57, %v4575_v38  ;;  %v4648_v58 = vadd.f32 %v1478_v24, %v4578_v5  ;;  %v2014_v57 = vsub.f32 1.0, %v1998_v21  ;;  %v1541_v38 = vsel %vm1533_vm2, %v4595_v16, %v4600_v26 }
 0x2b9   : > { %v1975_v5 = vmul.f32 1.442695, %v1967_v35  ;;  %v1939_v1 = vadd.f32 0.2548296, %v1931_v19  ;;  %v1572_v23 = vmul.f32 %v5274_v31, %v1541_v38  ;;  %v2021_v16 = vsel %vm2005_vm9, %v2013_v30, %v1997_v7  ;;  %v4681_v35 = vpop.permute.xlu0 %1728  ;;  %v5303_v19 = vld [vmem:[#allocation40_spill] sm:$0xff] }
 0x2ba   : > { %v1651_v50 = vpop.permute.xlu1 %1650  ;;  %v2022_v26 = vsel %vm2006_vm10, %v2014_v57, %v1998_v21  ;;  %v1905_v22 = vadd.f32 1.4214138, %v1897_v29  ;;  %v1906_v62 = vadd.f32 1.4214138, %v1898_v6  ;;  %v1944_v24 = vmul.f32 %v4568_v49, %v1936_v28 }
 0x2bb   : > { %2504 = vpow2.f32 %v1975_v5  ;;  %v1947_v41 = vmul.f32 %v4581_v56, %v1939_v1  ;;  %v1620_v9 = vmul.f32 %v4520_v25, %v1572_v23  ;;  %v1621_v14 = vmul.f32 %v4520_v25, %v1573_v46  ;;  %v5304_v25 = vld [vmem:[#allocation41_spill] sm:$0xff]  ;;  %v2501_v5 = vpop.eup %2500 }
 0x2bc   : > { %v2029_v21 = vmul.f32 %v2021_v16, %v4116_v43  ;;  %v2030_v10 = vmul.f32 %v2022_v26, %v4119_v61  ;;  %v1913_v49 = vmul.f32 %v4616_v59, %v1905_v22  ;;  %v1914_v15 = vmul.f32 %v4618_v33, %v1906_v62 }
 0x2bd   : > { %v1969_v43 = vmul.f32 %v1961_v34, %v4552_v27  ;;  %v1970_v61 = vmul.f32 %v1962_v12, %v4559_v55  ;;  %v1540_v30 = vsel %vm1533_vm2, %v4586_v42, %v4497_v40  ;;  %v1955_v57 = vmul.f32 0.5, %v1947_v41 }
 0x2be   : > { %v1653_v8 = vpop.permute.xlu1 %1652  ;;  %v1956_v38 = vmul.f32 0.5, %v1948_v60  ;;  %v1636_v29 = vadd.f32 %v1620_v9, %v4524_v3  ;;  %v1637_v6 = vadd.f32 %v1621_v14, %v4527_v45  ;;  %v1677_v1 = vsel %vm1670_vm8, %v1651_v50, %v4622_v0 }
 0x2bf   : > { %v1685_v40 = vsel %vm1670_vm8, %v4622_v0, %v1651_v50  ;;  %v2340_v42 = vadd.f32 -0.28449672, %v1913_v49  ;;  %v2341_v48 = vadd.f32 -0.28449672, %v1914_v15  ;;  %v1570_v3 = vmul.f32 %v5274_v31, %v1540_v30  ;;  %v2503_v50 = vpop.eup %2502 }
 0x2c0   : > { %v1571_v45 = vmul.f32 %v5275_v53, %v1548_v37  ;;  %v1995_v46 = vmul.f32 %v2499_v63, %v1955_v57  ;;  %v1979_v16 = vmul.f32 1.442695, %v1969_v43  ;;  %v1981_v26 = vmul.f32 1.442695, %v1970_v61  ;;  %v5306_v37 = vld [vmem:[#allocation23_spill] sm:$0xff] }
 0x2c1   : > { %v1707_v22 = vmul.f32 %v5303_v19, %v1677_v1  ;;  %v1708_v62 = vmul.f32 %v5304_v25, %v1685_v40  ;;  %v1952_v41 = vmul.f32 0.5, %v1944_v24  ;;  %v1929_v60 = vmul.f32 %v4616_v59, %v2340_v42  ;;  %v5307_v42 = vld [vmem:[#allocation63_spill] sm:$0xff] }
 0x2c2   : > { %v1669_v7 = vpop.permute.xlu1 %1668  ;;  %v1930_v9 = vmul.f32 %v4618_v33, %v2341_v48  ;;  %v1618_v14 = vmul.f32 %v4465_v20, %v1570_v3  ;;  %v2011_v15 = vsub.f32 1.0, %v1995_v46  ;;  %2506 = vpow2.f32 %v1979_v16  ;;  %v5308_v3 = vld [vmem:[#allocation61_spill] sm:$0xff] }
 0x2c3   : > { %v1678_v56 = vsel %vm1670_vm8, %v1653_v8, %v1669_v7  ;;  %v1686_v11 = vsel %vm1670_vm8, %v1669_v7, %v1653_v8  ;;  %v1996_v8 = vmul.f32 %v2501_v5, %v1956_v38  ;;  %v1619_v7 = vmul.f32 %v4465_v20, %v1571_v45 }
 0x2c4   : > { %v1709_v51 = vmul.f32 %v5303_v19, %v1678_v56  ;;  %v1710_v44 = vmul.f32 %v5304_v25, %v1686_v11  ;;  %v1755_v43 = vmul.f32 %v4609_v54, %v1707_v22  ;;  %v1756_v24 = vmul.f32 %v4609_v54, %v1708_v62  ;;  %v5305_v54 = vld [vmem:[#allocation52_spill] sm:$0xff] }
 0x2c5   : > { %2508 = vpow2.f32 %v1981_v26  ;;  %v1937_v20 = vadd.f32 0.2548296, %v1929_v60  ;;  %v1634_v30 = vadd.f32 %v1618_v14, %v5305_v54  ;;  %v1635_v57 = vadd.f32 %v1619_v7, %v5306_v37  ;;  %v5309_v14 = vld [vmem:[#allocation50_spill] sm:$0xff]  ;;  %v5310_v7 = vld [vmem:[#allocation83_spill] sm:$0xff]  ;;  %v5312_v37 = vld [vmem:[#allocation93_spill] sm:$0xff] }
 0x2c6   : > { %v1757_v27 = vmul.f32 %v4607_v17, %v1709_v51  ;;  %v1758_v55 = vmul.f32 %v4607_v17, %v1710_v44  ;;  %v4705_v28 = vpop.permute.xlu1 %1511  ;;  %v1821_v17 = vpop.permute.xlu0 %1820  ;;  %v2012_v51 = vsub.f32 1.0, %v1996_v8  ;;  %v1951_v44 = vmul.f32 0.5, %v1943_v39  ;;  %v5311_v54 = vld [vmem:[#allocation95_spill] sm:$0xff] }
 0x2c7   : > { %v1546_v39 = vsel %vm1533_vm2, %v4666_v36, %v4642_v52  ;;  %v2019_v38 = vsel %vm2003_vm11, %v2011_v15, %v1995_v46  ;;  %v1992_v63 = vmul.f32 %v2503_v50, %v1952_v41  ;;  %v1945_v1 = vmul.f32 %v4616_v59, %v1937_v20 }
 0x2c8   : > { %v1773_v47 = vadd.f32 %v1757_v27, %v1636_v29  ;;  %v1774_v23 = vadd.f32 %v1758_v55, %v1637_v6  ;;  %v2505_v49 = vpop.eup %2504  ;;  %v2020_v2 = vsel %vm2004_vm12, %v2012_v51, %v1996_v8  ;;  %v1771_v29 = vadd.f32 %v1755_v43, %v1634_v30 }
 0x2c9   : > { %v1991_v32 = vmul.f32 %v2505_v49, %v1951_v44  ;;  %v1772_v6 = vadd.f32 %v1756_v24, %v1635_v57  ;;  %v1567_v55 = vmul.f32 %v5275_v53, %v1546_v39  ;;  %v2027_v48 = vmul.f32 %v2019_v38, %v5307_v42  ;;  %v5313_v38 = vld [vmem:[#allocation7_spill] sm:$0xff] }
 0x2ca   : > { %v1837_v34 = vadd.f32 %v1821_v17, %v1773_v47  ;;  %v1528_v12 = vpop.permute.xlu1 %1527  ;;  %v1838_v0 = vadd.f32 %v1821_v17, %v1774_v23  ;;  %v2028_v45 = vmul.f32 %v2020_v2, %v5308_v3  ;;  %v2008_v47 = vsub.f32 1.0, %v1992_v63  ;;  %v1663_v26 = vpop.permute.xlu0 %1662  ;;  %v5316_v3 = vld [vmem:[#allocation6_spill] sm:$0xff] }
 0x2cb   : > { %v2007_v23 = vsub.f32 1.0, %v1991_v32  ;;  %v1615_v46 = vmul.f32 %v4640_v18, %v1567_v55  ;;  %v1539_v59 = vsel %vm1533_vm2, %v4705_v28, %v1528_v12  ;;  %v1953_v62 = vmul.f32 0.5, %v1945_v1 }
 0x2cc   : > { %v4721_v56 = vmul.f32 %v2029_v21, %v1837_v34  ;;  %v2038_v11 = vmul.f32 %v2030_v10, %v1838_v0  ;;  %v1938_v21 = vadd.f32 0.2548296, %v1930_v9  ;;  %v1538_v10 = vsel %vm1533_vm2, %v4642_v52, %v4666_v36 }
 0x2cd   : > { %v1566_v27 = vmul.f32 %v5274_v31, %v1538_v10  ;;  %vm2000_vm13 = vcmp.ge.f32.partialorder %v5309_v14, 0.0  ;;  %vm1999_vm14 = vcmp.ge.f32.partialorder %v5310_v7, 0.0  ;;  %v1568_v44 = vmul.f32 %v5274_v31, %v1539_v59 }
 0x2ce   : > { %v1946_v40 = vmul.f32 %v4618_v33, %v1938_v21  ;;  %v1547_v33 = vsel %vm1533_vm2, %v1528_v12, %v4705_v28  ;;  %v2016_v49 = vsel %vm2000_vm13, %v2008_v47, %v1992_v63  ;;  %v2015_v15 = vsel %vm1999_vm14, %v2007_v23, %v1991_v32  ;;  %v1806_v30 = vpop.permute.xlu0 %1805 }
 0x2cf   : > { %v4725_v61 = vpop.permute.xlu1 %1732  ;;  %v1614_v17 = vmul.f32 %v4640_v18, %v1566_v27  ;;  %v2507_v28 = vpop.eup %2506  ;;  %v2023_v57 = vmul.f32 %v2015_v15, %v5312_v37  ;;  %v1616_v2 = vmul.f32 %v5313_v38, %v1568_v44 }
 0x2d0   : > { %v1954_v34 = vmul.f32 0.5, %v1946_v40  ;;  %v1993_v21 = vmul.f32 %v2507_v28, %v1953_v62 }
 0x2d1   : > { %v1630_v12 = vadd.f32 %v1614_v17, %v4645_v13 }
 0x2d2   : > { %v2509_v51 = vpop.eup %2508 }
 0x2d3   : > { %v1994_v10 = vmul.f32 %v2509_v51, %v1954_v34 }
 0x2d4   : > { %v1816_v5 = vpop.permute.xlu1 %1815 }
 0x2d5   : > { %v1835_v52 = vadd.f32 %v1816_v5, %v1771_v29  ;;  %v1836_v36 = vadd.f32 %v1816_v5, %v1772_v6  ;;  %v2009_v6 = vsub.f32 1.0, %v1993_v21  ;;  %v2010_v27 = vsub.f32 1.0, %v1994_v10 }
 0x2d7   : > { %v2035_v8 = vmul.f32 %v2027_v48, %v1835_v52  ;;  %v2036_v16 = vmul.f32 %v2028_v45, %v1836_v36  ;;  %v5314_v52 = vld [vmem:[#allocation34_spill] sm:$0xff]  ;;  %v5315_v36 = vld [vmem:[#allocation35_spill] sm:$0xff]  ;;  %v1632_v45 = vadd.f32 %v1616_v2, %v5316_v3 }
 0x2d8   : > { %v1647_v22 = vpop.permute.xlu1 %1646  ;;  %vm2001_vm15 = vcmp.ge.f32.partialorder %v5314_v52, 0.0  ;;  %vm2002_vm0 = vcmp.ge.f32.partialorder %v5315_v36, 0.0 }
 0x2d9   : > { %v2043_v0 = vpack.c.bf16 %v4721_v56, %v2035_v8  ;;  %v1675_v50 = vsel %vm1670_vm8, %v1647_v22, %v1663_v26  ;;  %v1683_v18 = vsel %vm1670_vm8, %v1663_v26, %v1647_v22  ;;  %v2044_v41 = vpack.c.bf16 %v2038_v11, %v2036_v16  ;;  %v5318_v26 = vld [vmem:[#allocation96_spill] sm:$0xff] }
 0x2da   : > { %v1703_v60 = vmul.f32 %v5303_v19, %v1675_v50  ;;  %v1704_v9 = vmul.f32 %v5304_v25, %v1683_v18  ;;  %v1631_v56 = vadd.f32 %v1615_v46, %v4648_v58  ;;  %v1569_v11 = vmul.f32 %v5275_v53, %v1547_v33  ;;  %v5319_v33 = vld [vmem:[#allocation60_spill] sm:$0xff]  ;;  %v2477_v50 = vld [vmem:[%s4850_s6] sm:$0xff]   ;;  %v2106_v18 = vpop.permute.xlu0 %2105 }
 0x2db   : > { %2066 = vmatprep.subr.bf16.mxu1 %v2044_v41  ;;  %v2024_v58 = vmul.f32 %v2016_v49, %v5311_v54  ;;  %v2017_v23 = vsel %vm2001_vm15, %v2009_v6, %v1993_v21  ;;  %v2018_v17 = vsel %vm2002_vm0, %v2010_v27, %v1994_v10 }
 0x2dc   : > { %v1751_v43 = vmul.f32 %v4681_v35, %v1703_v60  ;;  %v1752_v24 = vmul.f32 %v4681_v35, %v1704_v9  ;;  %v1649_v20 = vpop.permute.xlu1 %1648  ;;  %2067 = vmatpush1.bf16.msra.mxu1 %v2043_v0  ;;  %v1617_v31 = vmul.f32 %v5313_v38, %v1569_v11  ;;  %v2025_v59 = vmul.f32 %v2017_v23, %v5318_v26 }
 0x2dd   : > { %v2026_v22 = vmul.f32 %v2018_v17, %v5319_v33 }
 0x2de   : > { %v1767_v39 = vadd.f32 %v1751_v43, %v1630_v12  ;;  %v1768_v13 = vadd.f32 %v1752_v24, %v1631_v56  ;;  %v1633_v47 = vadd.f32 %v1617_v31, %v5317_v4 }
 0x2e0   : > { %v1831_v53 = vadd.f32 %v1806_v30, %v1767_v39  ;;  %v1832_v63 = vadd.f32 %v1806_v30, %v1768_v13  ;;  %v1665_v32 = vpop.permute.xlu1 %1664 }
 0x2e1   : > { %v1676_v35 = vsel %vm1670_vm8, %v1649_v20, %v1665_v32  ;;  %v1684_v29 = vsel %vm1670_vm8, %v1665_v32, %v1649_v20 }
 0x2e2   : > { %v2031_v55 = vmul.f32 %v2023_v57, %v1831_v53  ;;  %v2032_v5 = vmul.f32 %v2024_v58, %v1832_v63  ;;  %v1705_v1 = vmul.f32 %v5303_v19, %v1676_v35  ;;  %v1706_v40 = vmul.f32 %v5304_v25, %v1684_v29 }
 0x2e4   : > { %v1753_v42 = vmul.f32 %v4725_v61, %v1705_v1  ;;  %v1754_v48 = vmul.f32 %v4725_v61, %v1706_v40  ;;  %v1811_v19 = vpop.permute.xlu1 %1810 }
 0x2e6   : > { %v1769_v46 = vadd.f32 %v1753_v42, %v1632_v45  ;;  %v1770_v8 = vadd.f32 %v1754_v48, %v1633_v47 }
 0x2e8   : > { %v1833_v16 = vadd.f32 %v1811_v19, %v1769_v46  ;;  %v1834_v25 = vadd.f32 %v1811_v19, %v1770_v8  ;;  %v2111_v7 = vpop.permute.xlu1 %2110 }
 0x2ea   : > { %v2033_v62 = vmul.f32 %v2025_v59, %v1833_v16  ;;  %v2034_v34 = vmul.f32 %v2026_v22, %v1834_v25 }
 0x2ec   : > { %v2041_v0 = vpack.c.bf16 %v2033_v62, %v2031_v55  ;;  %v2042_v61 = vpack.c.bf16 %v2034_v34, %v2032_v5 }
 0x2ee   : > { %2068 = vmatprep.subr.bf16.mxu1 %v2042_v61 }
 0x2ef   : > { %2069 = vmatpush1.bf16.msra.mxu1 %v2041_v0 }
 0x2f2   : > { %2347 = vmatmul.mubr.msk.bf16.vlgmr.msra.gmra.mxu1 %vm2050_vm1, %v2477_v50 }
 0x3b2   : > { %v2088_v41 = vpop.f32.mrf.mxu1 }
 0x3b3   : > { %v2113_v60 = vadd.f32 %v2106_v18, %v2088_v41 }
 0x3b4   : > { %v2090_v9 = vpop.f32.mrf.mxu1 }
 0x3b5   : > { %2144 = vst [vmem:[%s385_s14] sm:$0xff] %v2113_v60  ;;  %v2114_v14 = vadd.f32 %v2106_v18, %v2090_v9 }
 0x3b6   : > { %v2092_v28 = vpop.f32.mrf.mxu1 }
 0x3b7   : > { %2145 = vst [vmem:[%s385_s14 + $0x8] sm:$0xff] %v2114_v14  ;;  %v2115_v12 = vadd.f32 %v2111_v7, %v2092_v28 }
 0x3b8   : > { %v2094_v56 = vpop.f32.mrf.mxu1 }
 0x3b9   : > { %2146 = vst [vmem:[%s385_s14 + $0x10] sm:$0xff] %v2115_v12  ;;  %v2116_v49 = vadd.f32 %v2111_v7, %v2094_v56 }
 0x3bb   : > { %2147 = vst [vmem:[%s385_s14 + $0x18] sm:$0xff] %v2116_v49 }
 0x3bc   : > { %2526 = shalt.err (!%p2523_p5)
}
 0x3bd   : > { %s2527_s12 = scalar_lea.hbm %s4796_s23, 512  ;;  %s2531_s25 = scalar_lea.hbm %s4852_s8, 1024 }
 0x3be   : > { %p2528_p6 = scmp.ne.s32.totalorder %s4796_s23, %s2527_s12  ;;  %p2532_p10 = scmp.lt.s32.totalorder %s4796_s23, %s4852_s8 }
 0x3bf   : > { %p2533_p11 = scmp.lt.s32.totalorder %s2531_s25, %s2527_s12 }
 0x3c0   : > { %p2529_p7 = pnand %p2528_p6, %p2695_p4 }
 0x3c1   : > { %p2534_p12 = por %p2533_p11, %p2532_p10 }
 0x3c2   : > { %p2530_p9 = pneg %p2529_p7 }
 0x3c4   : > { %p2535_p13 = pnand %p2534_p12, %p2530_p9 }
 0x3c6   : > { %2538 = shalt.err (!%p2535_p13)
}
 0x3c7   : > { %s2609_s20 = smov 256  }
 0x3c8   : > { %2357 = dma.vmem_to_hbm [thread:$0]  (%p2695_p4), %s4791_s19, 512, %s4796_s23, %s4798_s22, %s2609_s20, %s2609_s20, %s2600_s16  }
 0x3c9 PF: > { %p2363_p0 = scmp.ge.s32.totalorder %s2589_s10, 2  ;;  %s2177_s11 = sand.u32 1, %s2569_s27  }
 0x3ca   : > { %s2178_s21 = scalar_lea.sflag [#allocation4], %s2177_s11 }
 0x3cb   : > { %p2360_p1 = pnand %p2363_p0, %p2702_p8 }
 0x3cd   : > { %p2361_p2 = pneg %p2360_p1 }
 0x3cf   : > { %2564 = dma.done.wait (%p2361_p2), %s2178_s21, 512  }
 0x3d0   : > { %2566 = vsyncadd (%p2361_p2), %s2178_s21, 4294966784  ;;  %s21_s10 = sadd.s32 1, %s2589_s10   ;;  %s5320_s27 = smov %s2573_s28 }
 0x3d1   : > { %p18_p3 = scmp.ge.s32.totalorder %s21_s10, 4   ;;  %s5321_s28 = smov %s2577_s29 }
 0x3d2   : > { %s5322_s29 = smov %s2708_s18  ;;  %s5323_s30 = smov %s2585_s9 }
 0x3d3   : > { %s5324_s9 = smov %s5326_s13  ;;  %20 = sbr.rel (!%p18_p3) target bundleno = 4 (0x4), region = 114 }
 0x3d8   :  { %2183 = vsyncpa [#allocation4], 1 }
 0x3d9   :  { %2185 = vsyncpa [#allocation4 + $0x1], 1 }

</bundles_post_ra>
